<compile_context>
chip_gen: v5e
topology: v5e:2x2
jax: 0.10.0
libtpu: 0.0.40
codegen_flags: <defaults>
</compile_context>

<pallas_src>
import numpy as np
import jax
import jax.numpy as jnp
from jax.experimental import pallas as pl
from jax.experimental.pallas import tpu as pltpu

KH = KW = 5
C_OUT = 32
N_CLASS = 10


def _round_up(x, m):
    return (x + m - 1) // m * m


def net_kernel(x_ref, bmat_ref, bconv_ref, wfc_ref, bfc_ref, out_ref):
    nb, H, W = x_ref.shape
    OH, OW = H - KH + 1, W - KW + 1

    # (NB, H, W) -> (NB*H, W): pure tile-index merge (H multiple of 8).
    xm = x_ref[...].reshape(nb * H, W)

    # Conv2d(1,32,5) as KH row-banded MXU matmuls:
    #   p_kh[n, r, j*32+c] = sum_w x[n, r, w] * bmat[kh, w, j*32+c]
    #                      = sum_kw x[n, r, j+kw] * w[c, kh, kw]
    # and the kh-sum is realized with sublane-shifted adds (r = i + kh).
    acc = None
    for kh in range(KH):
        p = jnp.dot(xm, bmat_ref[kh], preferred_element_type=jnp.float32)
        p = p.reshape(nb, H, OW * C_OUT)[:, kh:kh + OH, :]   # (NB, OH, OW*32)
        acc = p if acc is None else acc + p

    # AdaptiveMaxPool2d(1): global max over spatial positions.
    m = jnp.max(acc, axis=1)                                 # max over i -> (NB, OW*32)
    pooled = m[:, 0:C_OUT]
    for j in range(1, OW):                                   # max over j lane-groups
        pooled = jnp.maximum(pooled, m[:, j * C_OUT:(j + 1) * C_OUT])

    # Conv bias hoisted past the max, then ReLU.
    feat = jnp.maximum(pooled + bconv_ref[...], 0.0)         # (NB, 32)

    # Linear(32, 10): one batched matmul per grid step.
    out_ref[...] = jnp.dot(feat, wfc_ref[...],
                           preferred_element_type=jnp.float32) + bfc_ref[...]


def net_forward(x_nchw, w_conv, b_conv, w_fc, b_fc, block_n=None):
    """x_nchw: (N, 1, H, W) float32 -> (N, 10) float32."""
    N, C, H, W = x_nchw.shape
    assert C == 1
    OW = W - KW + 1
    x = x_nchw.reshape(N, H, W).astype(jnp.float32)

    # Batch-block size: multiple of 8, capped so VMEM stays tiny.
    if block_n is None:
        block_n = min(64, _round_up(N, 8))
    n_pad = _round_up(N, block_n)
    if n_pad != N:
        x = jnp.concatenate(
            [x, jnp.zeros((n_pad - N, H, W), jnp.float32)], axis=0)

    # ---- weight preprocessing (wrapper side, weights only) ----
    # bmat[kh, w, j*32 + c] = w_conv[c, 0, kh, w - j] if 0 <= w-j < KW else 0.
    wc = w_conv.reshape(C_OUT, KH, KW).astype(jnp.float32)
    shift = np.zeros((KW, W, OW), np.float32)
    for kw in range(KW):
        for j in range(OW):
            shift[kw, j + kw, j] = 1.0
    shift = jnp.asarray(shift)
    bmat = jnp.einsum('kwj,chk->hwjc', shift, wc).reshape(KH, W, OW * C_OUT)

    b_conv_row = b_conv.reshape(1, C_OUT).astype(jnp.float32)
    w_fc_mat = w_fc.T.astype(jnp.float32)                    # (32, 10)
    b_fc_row = b_fc.reshape(1, N_CLASS).astype(jnp.float32)

    out = pl.pallas_call(
        net_kernel,
        out_shape=jax.ShapeDtypeStruct((n_pad, N_CLASS), jnp.float32),
        grid_spec=pltpu.PrefetchScalarGridSpec(
            num_scalar_prefetch=0,
            grid=(n_pad // block_n,),
            in_specs=[
                pl.BlockSpec((block_n, H, W), lambda i: (i, 0, 0)),
                # Constant index_maps -> weights stay resident in VMEM.
                pl.BlockSpec((KH, W, OW * C_OUT), lambda i: (0, 0, 0)),
                pl.BlockSpec((1, C_OUT), lambda i: (0, 0)),
                pl.BlockSpec((C_OUT, N_CLASS), lambda i: (0, 0)),
                pl.BlockSpec((1, N_CLASS), lambda i: (0, 0)),
            ],
            out_specs=pl.BlockSpec((block_n, N_CLASS), lambda i: (i, 0)),
        ),
        compiler_params=pltpu.CompilerParams(
            dimension_semantics=("parallel",)),
    )(x, bmat, b_conv_row, w_fc_mat, b_fc_row)
    return out[:N]


def net_reference(x_nchw, w_conv, b_conv, w_fc, b_fc):
    """Pure-JAX reference for validation."""
    conv = jax.lax.conv_general_dilated(
        x_nchw, w_conv, window_strides=(1, 1), padding="VALID",
        dimension_numbers=("NCHW", "OIHW", "NCHW"))
    conv = conv + b_conv.reshape(1, C_OUT, 1, 1)
    pooled = jnp.max(conv, axis=(2, 3))                      # (N, 32)
    feat = jnp.maximum(pooled, 0.0)
    return feat @ w_fc.T + b_fc


if __name__ == "__main__":
    key = jax.random.PRNGKey(0)
    k_x, k_wc, k_bc, k_wf, k_bf = jax.random.split(key, 5)

    N, H, W = 2, 16, 16
    x = jax.random.normal(k_x, (N, 1, H, W), dtype=jnp.float32)

    # Deterministic parameter init (shapes per the module's __init__).
    w_conv = jax.random.normal(k_wc, (C_OUT, 1, KH, KW), jnp.float32) * 0.2
    b_conv = jax.random.normal(k_bc, (C_OUT,), jnp.float32) * 0.1
    w_fc = jax.random.normal(k_wf, (N_CLASS, C_OUT), jnp.float32) * 0.18
    b_fc = jax.random.normal(k_bf, (N_CLASS,), jnp.float32) * 0.1

    out = jax.block_until_ready(net_forward(x, w_conv, b_conv, w_fc, b_fc))

    ref = net_reference(x, w_conv, b_conv, w_fc, b_fc)
    assert out.shape == (N, N_CLASS)
    assert jnp.allclose(out, ref, atol=1e-4, rtol=1e-4), "mismatch vs reference"

    print("KERNEL_OK")
</pallas_src>

<mosaic_0001>
module attributes {stable_mosaic.version = 11 : i64} {
  func.func @net_kernel(%arg0: i32, %arg1: memref<8x16x16xf32, #tpu.memory_space<vmem>>, %arg2: memref<5x16x384xf32, #tpu.memory_space<vmem>>, %arg3: memref<1x32xf32, #tpu.memory_space<vmem>>, %arg4: memref<32x10xf32, #tpu.memory_space<vmem>>, %arg5: memref<1x10xf32, #tpu.memory_space<vmem>>, %arg6: memref<8x10xf32, #tpu.memory_space<vmem>>) attributes {dimension_semantics = [#tpu.dimension_semantics<parallel>], iteration_bounds = array<i64: 1>, scalar_prefetch = 0 : i64, scratch_operands = 0 : i64, tpu.core_type = #tpu.core_type<tc>, window_params = [{transform_indices = @transform_0, window_bounds = array<i64: 8, 16, 16>}, {pipeline_mode = #tpu.pipeline_mode<synchronous>, transform_indices = @transform_1, window_bounds = array<i64: 5, 16, 384>}, {pipeline_mode = #tpu.pipeline_mode<synchronous>, transform_indices = @transform_2, window_bounds = array<i64: 1, 32>}, {pipeline_mode = #tpu.pipeline_mode<synchronous>, transform_indices = @transform_3, window_bounds = array<i64: 32, 10>}, {pipeline_mode = #tpu.pipeline_mode<synchronous>, transform_indices = @transform_4, window_bounds = array<i64: 1, 10>}, {transform_indices = @transform_5, window_bounds = array<i64: 8, 10>}]} {
    %c0 = arith.constant 0 : index
    %c0_0 = arith.constant 0 : index
    %c0_1 = arith.constant 0 : index
    %0 = vector.load %arg1[%c0, %c0_0, %c0_1] : memref<8x16x16xf32, #tpu.memory_space<vmem>>, vector<8x16x16xf32>
    %1 = vector.shape_cast %0 : vector<8x16x16xf32> to vector<128x16xf32>
    %c0_2 = arith.constant 0 : index
    %c0_3 = arith.constant 0 : index
    %c0_4 = arith.constant 0 : index
    %2 = vector.load %arg2[%c0_2, %c0_3, %c0_4] : memref<5x16x384xf32, #tpu.memory_space<vmem>>, vector<1x16x384xf32>
    %3 = vector.shape_cast %2 : vector<1x16x384xf32> to vector<16x384xf32>
    %cst = arith.constant dense<0.000000e+00> : vector<128x384xf32>
    %4 = tpu.matmul %1, %3, %cst {dimension_numbers = #tpu.dot_dimension_numbers<[1], [0], [0], [1], [0, 0, 1, 1], [], []>} : vector<128x16xf32>, vector<16x384xf32>, vector<128x384xf32> -> vector<128x384xf32>
    %5 = vector.shape_cast %4 : vector<128x384xf32> to vector<8x16x384xf32>
    %6 = vector.extract_strided_slice %5 {offsets = [0, 0, 0], sizes = [8, 12, 384], strides = [1, 1, 1]} : vector<8x16x384xf32> to vector<8x12x384xf32>
    %c1 = arith.constant 1 : index
    %c0_5 = arith.constant 0 : index
    %c0_6 = arith.constant 0 : index
    %7 = vector.load %arg2[%c1, %c0_5, %c0_6] : memref<5x16x384xf32, #tpu.memory_space<vmem>>, vector<1x16x384xf32>
    %8 = vector.shape_cast %7 : vector<1x16x384xf32> to vector<16x384xf32>
    %cst_7 = arith.constant dense<0.000000e+00> : vector<128x384xf32>
    %9 = tpu.matmul %1, %8, %cst_7 {dimension_numbers = #tpu.dot_dimension_numbers<[1], [0], [0], [1], [0, 0, 1, 1], [], []>} : vector<128x16xf32>, vector<16x384xf32>, vector<128x384xf32> -> vector<128x384xf32>
    %10 = vector.shape_cast %9 : vector<128x384xf32> to vector<8x16x384xf32>
    %11 = vector.extract_strided_slice %10 {offsets = [0, 1, 0], sizes = [8, 12, 384], strides = [1, 1, 1]} : vector<8x16x384xf32> to vector<8x12x384xf32>
    %12 = arith.addf %6, %11 : vector<8x12x384xf32>
    %c2 = arith.constant 2 : index
    %c0_8 = arith.constant 0 : index
    %c0_9 = arith.constant 0 : index
    %13 = vector.load %arg2[%c2, %c0_8, %c0_9] : memref<5x16x384xf32, #tpu.memory_space<vmem>>, vector<1x16x384xf32>
    %14 = vector.shape_cast %13 : vector<1x16x384xf32> to vector<16x384xf32>
    %cst_10 = arith.constant dense<0.000000e+00> : vector<128x384xf32>
    %15 = tpu.matmul %1, %14, %cst_10 {dimension_numbers = #tpu.dot_dimension_numbers<[1], [0], [0], [1], [0, 0, 1, 1], [], []>} : vector<128x16xf32>, vector<16x384xf32>, vector<128x384xf32> -> vector<128x384xf32>
    %16 = vector.shape_cast %15 : vector<128x384xf32> to vector<8x16x384xf32>
    %17 = vector.extract_strided_slice %16 {offsets = [0, 2, 0], sizes = [8, 12, 384], strides = [1, 1, 1]} : vector<8x16x384xf32> to vector<8x12x384xf32>
    %18 = arith.addf %12, %17 : vector<8x12x384xf32>
    %c3 = arith.constant 3 : index
    %c0_11 = arith.constant 0 : index
    %c0_12 = arith.constant 0 : index
    %19 = vector.load %arg2[%c3, %c0_11, %c0_12] : memref<5x16x384xf32, #tpu.memory_space<vmem>>, vector<1x16x384xf32>
    %20 = vector.shape_cast %19 : vector<1x16x384xf32> to vector<16x384xf32>
    %cst_13 = arith.constant dense<0.000000e+00> : vector<128x384xf32>
    %21 = tpu.matmul %1, %20, %cst_13 {dimension_numbers = #tpu.dot_dimension_numbers<[1], [0], [0], [1], [0, 0, 1, 1], [], []>} : vector<128x16xf32>, vector<16x384xf32>, vector<128x384xf32> -> vector<128x384xf32>
    %22 = vector.shape_cast %21 : vector<128x384xf32> to vector<8x16x384xf32>
    %23 = vector.extract_strided_slice %22 {offsets = [0, 3, 0], sizes = [8, 12, 384], strides = [1, 1, 1]} : vector<8x16x384xf32> to vector<8x12x384xf32>
    %24 = arith.addf %18, %23 : vector<8x12x384xf32>
    %c4 = arith.constant 4 : index
    %c0_14 = arith.constant 0 : index
    %c0_15 = arith.constant 0 : index
    %25 = vector.load %arg2[%c4, %c0_14, %c0_15] : memref<5x16x384xf32, #tpu.memory_space<vmem>>, vector<1x16x384xf32>
    %26 = vector.shape_cast %25 : vector<1x16x384xf32> to vector<16x384xf32>
    %cst_16 = arith.constant dense<0.000000e+00> : vector<128x384xf32>
    %27 = tpu.matmul %1, %26, %cst_16 {dimension_numbers = #tpu.dot_dimension_numbers<[1], [0], [0], [1], [0, 0, 1, 1], [], []>} : vector<128x16xf32>, vector<16x384xf32>, vector<128x384xf32> -> vector<128x384xf32>
    %28 = vector.shape_cast %27 : vector<128x384xf32> to vector<8x16x384xf32>
    %29 = vector.extract_strided_slice %28 {offsets = [0, 4, 0], sizes = [8, 12, 384], strides = [1, 1, 1]} : vector<8x16x384xf32> to vector<8x12x384xf32>
    %30 = arith.addf %24, %29 : vector<8x12x384xf32>
    %cst_17 = arith.constant dense<0xFF800000> : vector<8x384xf32>
    %31 = vector.multi_reduction <maximumf>, %30, %cst_17 [1] : vector<8x12x384xf32> to vector<8x384xf32>
    %32 = vector.extract_strided_slice %31 {offsets = [0, 0], sizes = [8, 32], strides = [1, 1]} : vector<8x384xf32> to vector<8x32xf32>
    %33 = vector.extract_strided_slice %31 {offsets = [0, 32], sizes = [8, 32], strides = [1, 1]} : vector<8x384xf32> to vector<8x32xf32>
    %34 = arith.maximumf %32, %33 : vector<8x32xf32>
    %35 = vector.extract_strided_slice %31 {offsets = [0, 64], sizes = [8, 32], strides = [1, 1]} : vector<8x384xf32> to vector<8x32xf32>
    %36 = arith.maximumf %34, %35 : vector<8x32xf32>
    %37 = vector.extract_strided_slice %31 {offsets = [0, 96], sizes = [8, 32], strides = [1, 1]} : vector<8x384xf32> to vector<8x32xf32>
    %38 = arith.maximumf %36, %37 : vector<8x32xf32>
    %39 = vector.extract_strided_slice %31 {offsets = [0, 128], sizes = [8, 32], strides = [1, 1]} : vector<8x384xf32> to vector<8x32xf32>
    %40 = arith.maximumf %38, %39 : vector<8x32xf32>
    %41 = vector.extract_strided_slice %31 {offsets = [0, 160], sizes = [8, 32], strides = [1, 1]} : vector<8x384xf32> to vector<8x32xf32>
    %42 = arith.maximumf %40, %41 : vector<8x32xf32>
    %43 = vector.extract_strided_slice %31 {offsets = [0, 192], sizes = [8, 32], strides = [1, 1]} : vector<8x384xf32> to vector<8x32xf32>
    %44 = arith.maximumf %42, %43 : vector<8x32xf32>
    %45 = vector.extract_strided_slice %31 {offsets = [0, 224], sizes = [8, 32], strides = [1, 1]} : vector<8x384xf32> to vector<8x32xf32>
    %46 = arith.maximumf %44, %45 : vector<8x32xf32>
    %47 = vector.extract_strided_slice %31 {offsets = [0, 256], sizes = [8, 32], strides = [1, 1]} : vector<8x384xf32> to vector<8x32xf32>
    %48 = arith.maximumf %46, %47 : vector<8x32xf32>
    %49 = vector.extract_strided_slice %31 {offsets = [0, 288], sizes = [8, 32], strides = [1, 1]} : vector<8x384xf32> to vector<8x32xf32>
    %50 = arith.maximumf %48, %49 : vector<8x32xf32>
    %51 = vector.extract_strided_slice %31 {offsets = [0, 320], sizes = [8, 32], strides = [1, 1]} : vector<8x384xf32> to vector<8x32xf32>
    %52 = arith.maximumf %50, %51 : vector<8x32xf32>
    %53 = vector.extract_strided_slice %31 {offsets = [0, 352], sizes = [8, 32], strides = [1, 1]} : vector<8x384xf32> to vector<8x32xf32>
    %54 = arith.maximumf %52, %53 : vector<8x32xf32>
    %c0_18 = arith.constant 0 : index
    %c0_19 = arith.constant 0 : index
    %55 = vector.load %arg3[%c0_18, %c0_19] : memref<1x32xf32, #tpu.memory_space<vmem>>, vector<1x32xf32>
    %56 = vector.broadcast %55 : vector<1x32xf32> to vector<8x32xf32>
    %57 = arith.addf %54, %56 : vector<8x32xf32>
    %cst_20 = arith.constant 0.000000e+00 : f32
    %58 = vector.broadcast %cst_20 : f32 to vector<8x32xf32>
    %59 = arith.maximumf %57, %58 : vector<8x32xf32>
    %c0_21 = arith.constant 0 : index
    %c0_22 = arith.constant 0 : index
    %60 = vector.load %arg4[%c0_21, %c0_22] : memref<32x10xf32, #tpu.memory_space<vmem>>, vector<32x10xf32>
    %cst_23 = arith.constant dense<0.000000e+00> : vector<8x10xf32>
    %61 = tpu.matmul %59, %60, %cst_23 {dimension_numbers = #tpu.dot_dimension_numbers<[1], [0], [0], [1], [0, 0, 1, 1], [], []>} : vector<8x32xf32>, vector<32x10xf32>, vector<8x10xf32> -> vector<8x10xf32>
    %c0_24 = arith.constant 0 : index
    %c0_25 = arith.constant 0 : index
    %62 = vector.load %arg5[%c0_24, %c0_25] : memref<1x10xf32, #tpu.memory_space<vmem>>, vector<1x10xf32>
    %63 = vector.broadcast %62 : vector<1x10xf32> to vector<8x10xf32>
    %64 = arith.addf %61, %63 : vector<8x10xf32>
    %c0_26 = arith.constant 0 : index
    %c0_27 = arith.constant 0 : index
    %65 = vector.load %arg6[%c0_26, %c0_27] : memref<8x10xf32, #tpu.memory_space<vmem>>, vector<8x10xf32>
    tpu.vector_store %arg6[%c0_26, %c0_27], %64 {strides = array<i32>} : memref<8x10xf32, #tpu.memory_space<vmem>>, vector<8x10xf32>,
    return
  }
  func.func @transform_0(%arg0: i32) -> (i32, i32, i32) {
    %c0_i32 = arith.constant 0 : i32
    %c0_i32_0 = arith.constant 0 : i32
    %c0_i32_1 = arith.constant 0 : i32
    return %arg0, %c0_i32, %c0_i32_0 : i32, i32, i32
  }
  func.func @transform_1(%arg0: i32) -> (i32, i32, i32) {
    %c0_i32 = arith.constant 0 : i32
    %c0_i32_0 = arith.constant 0 : i32
    %c0_i32_1 = arith.constant 0 : i32
    %c0_i32_2 = arith.constant 0 : i32
    return %c0_i32, %c0_i32_0, %c0_i32_1 : i32, i32, i32
  }
  func.func @transform_2(%arg0: i32) -> (i32, i32) {
    %c0_i32 = arith.constant 0 : i32
    %c0_i32_0 = arith.constant 0 : i32
    %c0_i32_1 = arith.constant 0 : i32
    return %c0_i32, %c0_i32_0 : i32, i32
  }
  func.func @transform_3(%arg0: i32) -> (i32, i32) {
    %c0_i32 = arith.constant 0 : i32
    %c0_i32_0 = arith.constant 0 : i32
    %c0_i32_1 = arith.constant 0 : i32
    return %c0_i32, %c0_i32_0 : i32, i32
  }
  func.func @transform_4(%arg0: i32) -> (i32, i32) {
    %c0_i32 = arith.constant 0 : i32
    %c0_i32_0 = arith.constant 0 : i32
    %c0_i32_1 = arith.constant 0 : i32
    return %c0_i32, %c0_i32_0 : i32, i32
  }
  func.func @transform_5(%arg0: i32) -> (i32, i32) {
    %c0_i32 = arith.constant 0 : i32
    %c0_i32_0 = arith.constant 0 : i32
    return %arg0, %c0_i32 : i32, i32
  }
}

</mosaic_0001>

<bundles_post_ra>
// kernel: tpu_custom_call.1
= control target key start
LH: loop header
LB: loop body
LE: loop exit
PB: predicated region body
PF: predicated region fallthrough
CT: control target
= control target key end

     0   :  { %10 = vsyncpa [#allocation3], 0  ;;  %s4502_s0 = inlined_call_operand.hbm [shape: f32[8,16,16], index: 0, kind: input, shape index: {}]   ;;  %s4503_s1 = inlined_call_operand.hbm [shape: f32[5,16,384], index: 1, kind: input, shape index: {}]   ;;  %s4504_s2 = inlined_call_operand.vmem [shape: f32[1,32], index: 2, kind: input, shape index: {}]   ;;  %s4505_s3 = inlined_call_operand.vmem [shape: f32[32,10], index: 3, kind: input, shape index: {}]   ;;  %s4506_s4 = inlined_call_operand.vmem [shape: f32[1,10], index: 4, kind: input, shape index: {}]   ;;  %s4507_s5 = inlined_call_operand.hbm [shape: f32[8,10], index: 5, kind: output, shape index: {}]  }
   0x1   :  { %11 = vsyncpa [#allocation6], 0 }
   0x2   :  { %12 = vsyncpa [#allocation4], 0  ;;  %s17_s20 = sshll.u32 %s4502_s0, 4  ;;  %s2960_s21 = smov [#allocation2]   ;;  %s18_s20 = int_to_ptr.hbm [resolvable:$true] %s17_s20 }
   0x3   :  { %s19_s22 = sshll.u32 %s2960_s21, 4  ;;  %s30_s25 = sshll.u32 %s4503_s1, 4  ;;  %s20_s22 = int_to_ptr.vmem [resolvable:$true] %s19_s22  ;;  %s31_s25 = int_to_ptr.hbm [resolvable:$true] %s30_s25 }
   0x4   :  { %s2961_s26 = smov 128   ;;  %s2962_s27 = smov 8  }
   0x5   :  { %25 = dma.hbm_to_vmem [thread:$0]  %s18_s20, 2048, %s20_s22, [#allocation3], %s2961_s26, %s2961_s26, %s2962_s27  }
   0x6   :  { %s2963_s28 = smov [#allocation5]   ;;  %s2964_s30 = smov 384  }
   0x7   :  { %s32_s29 = sshll.u32 %s2963_s28, 4  ;;  %s2965_s6 = smov 24   ;;  %s33_s29 = int_to_ptr.vmem [resolvable:$true] %s32_s29 }
   0x8   :  { %38 = dma.hbm_to_vmem [thread:$0]  %s31_s25, 3840, %s33_s29, [#allocation6], %s2964_s30, %s2964_s30, %s2965_s6  }
   0x9   :  { %2954 = dma.done.wait [#allocation3], 2048  }
   0xa   :  { %2955 = vsyncadd [#allocation3], 4294965248 }
   0xb   :  { %2956 = dma.done.wait [#allocation6], 3840  }
   0xc   :  { %2957 = vsyncadd [#allocation6], 4294963456  ;;  %v72_v0 = vld [vmem:[#allocation5 + $0x18] sm:$0xff]  ;;  %v73_v1 = vld [vmem:[#allocation5 + $0x20] sm:$0xff]  ;;  %vm75_vm0 = vcmask 130048   ;;  %vm569_vm1 = vcmask 1046528  }
   0xd   :  { %v74_v2 = vld [vmem:[#allocation5 + $0x28] sm:$0xff]  ;;  %138 = vmatpush.msra.mxu0 %v72_v0  ;;  %2856 = vmatpush.msra.mxu3 %v72_v0  ;;  %v69_v3 = vld [vmem:[#allocation5] sm:$0xff]  ;;  %v71_v5 = vld [vmem:[#allocation5 + $0x10] sm:$0xff]  ;;  %vm988_vm2 = vcmask 1045504   ;;  %vm1407_vm3 = vcmask 1044480   ;;  %vm1826_vm4 = vcmask 1043456  }
   0xe   :  { %v70_v4 = vld [vmem:[#allocation5 + $0x8] sm:$0xff]  ;;  %203 = vmatpush.msra.mxu1 %v73_v1  ;;  %268 = vmatpush.msra.mxu2 %v74_v2  ;;  %v3006_v6 = vld [vmem:[#allocation2] sm:$0xff]  ;;  %v324_v8 = vld [vmem:[#allocation5 + $0x50] sm:$0xff]  ;;  %s2966_s0 = smov 32   ;;  %s2967_s1 = smov 64   ;;  %vm2552_vm5 = vcmask 1041409  }
   0xf   :  { %v3008_v7 = vld [vmem:[#allocation2 + $0x68] sm:$0xff]  ;;  %139 = vmatpush.msra.mxu0 %v69_v3  ;;  %2857 = vmatpush.msra.mxu3 %v69_v3  ;;  %v325_v9 = vld [vmem:[#allocation5 + $0x58] sm:$0xff]  ;;  %v3020_v12 = vld [vmem:[#allocation2 + $0x70] sm:$0xff]  ;;  %s2968_s7 = smov 96   ;;  %vm2555_vm6 = vcmask 1042434   ;;  %vm2558_vm7 = vcmask 1043459  }
  0x10   :  { %204 = vmatpush.msra.mxu1 %v70_v4  ;;  %269 = vmatpush.msra.mxu2 %v71_v5  ;;  %v742_v10 = vld [vmem:[#allocation5 + $0x78] sm:$0xff]  ;;  %v3018_v11 = vld [vmem:[#allocation2 + $0x8] sm:$0xff]  ;;  %v3030_v13 = vld [vmem:[#allocation2 + $0x10] sm:$0xff]  ;;  %vm2561_vm8 = vcmask 1044484   ;;  %vm2564_vm9 = vcmask 1045509   ;;  %vm2567_vm10 = vcmask 1046534  }
  0x11   :  { %2615 = vmatmul.msk.f32.vlgmr.msra.gmra.mxu0 %vm75_vm0, %v3006_v6  ;;  %2628 = vmatmul.msk.f32.vlgmr.msra.gmra.mxu3 %vm75_vm0, %v3008_v7  ;;  %v3032_v14 = vld [vmem:[#allocation2 + $0x78] sm:$0xff]  ;;  %v322_v17 = vld [vmem:[#allocation5 + $0x40] sm:$0xff]  ;;  %v323_v19 = vld [vmem:[#allocation5 + $0x48] sm:$0xff]  ;;  %vm2570_vm11 = vcmask 1047559   ;;  %vm2572_vm12 = vcmask 261120   ;;  %s2969_s18 = smov [#allocation7]  }
  0x12   :  { %2631 = vmatmul.msk.f32.vlgmr.msra.gmra.mxu1 %vm75_vm0, %v3006_v6  ;;  %2647 = vmatmul.msk.f32.vlgmr.msra.gmra.mxu2 %vm75_vm0, %v3006_v6  ;;  %v321_v15 = vld [vmem:[#allocation5 + $0x38] sm:$0xff]  ;;  %v3052_v18 = vld [vmem:[#allocation2 + $0x20] sm:$0xff]  ;;  %v320_v21 = vld [vmem:[#allocation5 + $0x30] sm:$0xff]  ;;  %s2602_s19 = sshll.u32 %s2969_s18, 4  ;;  %s2604_s22 = sshll.u32 %s4507_s5, 4  ;;  %vm2595_vm13 = vcmask 80896   ;;  %s2603_s19 = int_to_ptr.vmem [resolvable:$true] %s2602_s19  ;;  %s2605_s22 = int_to_ptr.hbm [resolvable:$true] %s2604_s22 }
  0x13   :  { %405 = vmatpush.msrb.mxu0 %v324_v8  ;;  %470 = vmatpush.msrb.mxu1 %v325_v9  ;;  %v3042_v16 = vld [vmem:[#allocation2 + $0x18] sm:$0xff]  ;;  %v739_v20 = vld [vmem:[#allocation5 + $0x60] sm:$0xff]  ;;  %v3062_v22 = vld [vmem:[#allocation2 + $0x28] sm:$0xff] }
  0x14   :  { %759 = vmatpush.msrb.mxu2 %v742_v10  ;;  %2858 = vmatpush.msrb.mxu3 %v73_v1  ;;  %v3072_v23 = vld [vmem:[#allocation2 + $0x30] sm:$0xff]  ;;  %v3082_v24 = vld [vmem:[#allocation2 + $0x38] sm:$0xff]  ;;  %v3092_v25 = vld [vmem:[#allocation2 + $0x40] sm:$0xff] }
  0x15   :  { %406 = vmatpush.msrb.mxu0 %v321_v15  ;;  %471 = vmatpush.msrb.mxu1 %v322_v17  ;;  %v3102_v26 = vld [vmem:[#allocation2 + $0x48] sm:$0xff]  ;;  %v3112_v28 = vld [vmem:[#allocation2 + $0x50] sm:$0xff]  ;;  %v3122_v30 = vld [vmem:[#allocation2 + $0x58] sm:$0xff] }
  0x16   :  { %2859 = vmatpush.msrb.mxu3 %v70_v4  ;;  %760 = vmatpush.msrb.mxu2 %v739_v20  ;;  %v744_v27 = vld [vmem:[#allocation5 + $0x88] sm:$0xff]  ;;  %v743_v31 = vld [vmem:[#allocation5 + $0x80] sm:$0xff]  ;;  %v1162_v32 = vld [vmem:[#allocation5 + $0xb0] sm:$0xff] }
  0x17   :  { %889 = vmatpush.msra.mxu0 %v744_v27  ;;  %v1161_v29 = vld [vmem:[#allocation5 + $0xa8] sm:$0xff]  ;;  %v3132_v33 = vld [vmem:[#allocation2 + $0x60] sm:$0xff]  ;;  %v741_v40 = vld [vmem:[#allocation5 + $0x70] sm:$0xff] }
  0x18   :  { %2860 = vmatpush.msra.mxu3 %v74_v2  ;;  %1178 = vmatpush.msra.mxu1 %v1161_v29  ;;  %v1158_v45 = vld [vmem:[#allocation5 + $0x90] sm:$0xff]  ;;  %v740_v50 = vld [vmem:[#allocation5 + $0x68] sm:$0xff]  ;;  %v1159_v51 = vld [vmem:[#allocation5 + $0x98] sm:$0xff] }
  0x19   :  { %2616 = vmatmul.msk.f32.gmra.mxu0 %vm75_vm0, %v3018_v11  ;;  %2629 = vmatmul.msk.f32.gmra.mxu3 %vm75_vm0, %v3020_v12  ;;  %v1580_v20 = vld [vmem:[#allocation5 + $0xd8] sm:$0xff] }
  0x1a   :  { %2632 = vmatmul.msk.f32.gmra.mxu1 %vm75_vm0, %v3018_v11  ;;  %2648 = vmatmul.msk.f32.gmra.mxu2 %vm75_vm0, %v3018_v11 }
  0x1b   :  { %2861 = vmatpush.msra.mxu3 %v71_v5  ;;  %1243 = vmatpush.msra.mxu2 %v1162_v32 }
  0x1c   :  { %890 = vmatpush.msra.mxu0 %v741_v40  ;;  %1179 = vmatpush.msra.mxu1 %v1158_v45  ;;  %v1581_v40 = vld [vmem:[#allocation5 + $0xe0] sm:$0xff] }
  0x1d   :  { %1244 = vmatpush.msra.mxu2 %v1159_v51 }
  0x21   :  { %2617 = vmatmul.msk.f32.gmra.mxu0 %vm75_vm0, %v3030_v13  ;;  %2630 = vmatmul.msk.f32.gmra.mxu3 %vm75_vm0, %v3032_v14 }
  0x22   :  { %2633 = vmatmul.msk.f32.gmra.mxu1 %vm75_vm0, %v3030_v13  ;;  %2649 = vmatmul.msk.f32.gmra.mxu2 %vm75_vm0, %v3030_v13 }
  0x29   :  { %2618 = vmatmul.msk.f32.gmra.mxu0 %vm75_vm0, %v3042_v16  ;;  %2644 = vmatmul.msk.f32.vlgmr.msrb.gmra.mxu3 %vm75_vm0, %v3008_v7 }
  0x2a   :  { %2634 = vmatmul.msk.f32.gmra.mxu1 %vm75_vm0, %v3042_v16  ;;  %2650 = vmatmul.msk.f32.gmra.mxu2 %vm75_vm0, %v3042_v16 }
  0x2b   :  { %340 = vmatpush.msrb.mxu3 %v323_v19 }
  0x2d   :  { %341 = vmatpush.msrb.mxu3 %v320_v21 }
  0x31   :  { %2619 = vmatmul.msk.f32.gmra.mxu0 %vm75_vm0, %v3052_v18  ;;  %2645 = vmatmul.msk.f32.gmra.mxu3 %vm75_vm0, %v3020_v12 }
  0x32   :  { %2635 = vmatmul.msk.f32.gmra.mxu1 %vm75_vm0, %v3052_v18  ;;  %2651 = vmatmul.msk.f32.gmra.mxu2 %vm75_vm0, %v3052_v18 }
  0x39   :  { %2620 = vmatmul.msk.f32.gmra.mxu0 %vm75_vm0, %v3062_v22  ;;  %2646 = vmatmul.msk.f32.gmra.mxu3 %vm75_vm0, %v3032_v14 }
  0x3a   :  { %2636 = vmatmul.msk.f32.gmra.mxu1 %vm75_vm0, %v3062_v22  ;;  %2652 = vmatmul.msk.f32.gmra.mxu2 %vm75_vm0, %v3062_v22 }
  0x41   :  { %2621 = vmatmul.msk.f32.gmra.mxu0 %vm75_vm0, %v3072_v23  ;;  %2660 = vmatmul.msk.f32.vlgmr.msra.gmra.mxu3 %vm75_vm0, %v3008_v7 }
  0x42   :  { %2637 = vmatmul.msk.f32.gmra.mxu1 %vm75_vm0, %v3072_v23  ;;  %2653 = vmatmul.msk.f32.gmra.mxu2 %vm75_vm0, %v3072_v23 }
  0x43   :  { %824 = vmatpush.msra.mxu3 %v743_v31 }
  0x45   :  { %825 = vmatpush.msra.mxu3 %v740_v50 }
  0x49   :  { %2622 = vmatmul.msk.f32.gmra.mxu0 %vm75_vm0, %v3082_v24  ;;  %2661 = vmatmul.msk.f32.gmra.mxu3 %vm75_vm0, %v3020_v12 }
  0x4a   :  { %2638 = vmatmul.msk.f32.gmra.mxu1 %vm75_vm0, %v3082_v24  ;;  %2654 = vmatmul.msk.f32.gmra.mxu2 %vm75_vm0, %v3082_v24 }
  0x51   :  { %2623 = vmatmul.msk.f32.gmra.mxu0 %vm75_vm0, %v3092_v25  ;;  %2662 = vmatmul.msk.f32.gmra.mxu3 %vm75_vm0, %v3032_v14 }
  0x52   :  { %2639 = vmatmul.msk.f32.gmra.mxu1 %vm75_vm0, %v3092_v25  ;;  %2655 = vmatmul.msk.f32.gmra.mxu2 %vm75_vm0, %v3092_v25 }
  0x59   :  { %2624 = vmatmul.msk.f32.gmra.mxu0 %vm75_vm0, %v3102_v26  ;;  %2663 = vmatmul.msk.f32.vlgmr.msrb.gmra.mxu3 %vm75_vm0, %v3006_v6 }
  0x5a   :  { %2640 = vmatmul.msk.f32.gmra.mxu1 %vm75_vm0, %v3102_v26  ;;  %2656 = vmatmul.msk.f32.gmra.mxu2 %vm75_vm0, %v3102_v26 }
  0x61   :  { %2625 = vmatmul.msk.f32.gmra.mxu0 %vm75_vm0, %v3112_v28  ;;  %2664 = vmatmul.msk.f32.gmra.mxu3 %vm75_vm0, %v3018_v11 }
  0x62   :  { %2641 = vmatmul.msk.f32.gmra.mxu1 %vm75_vm0, %v3112_v28  ;;  %2657 = vmatmul.msk.f32.gmra.mxu2 %vm75_vm0, %v3112_v28 }
  0x69   :  { %2626 = vmatmul.msk.f32.gmra.mxu0 %vm75_vm0, %v3122_v30  ;;  %2665 = vmatmul.msk.f32.gmra.mxu3 %vm75_vm0, %v3030_v13 }
  0x6a   :  { %2642 = vmatmul.msk.f32.gmra.mxu1 %vm75_vm0, %v3122_v30  ;;  %2658 = vmatmul.msk.f32.gmra.mxu2 %vm75_vm0, %v3122_v30 }
  0x71   :  { %2627 = vmatmul.msk.f32.gmra.mxu0 %vm75_vm0, %v3132_v33  ;;  %2666 = vmatmul.msk.f32.gmra.mxu3 %vm75_vm0, %v3042_v16 }
  0x72   :  { %2643 = vmatmul.msk.f32.gmra.mxu1 %vm75_vm0, %v3132_v33  ;;  %2659 = vmatmul.msk.f32.gmra.mxu2 %vm75_vm0, %v3132_v33 }
  0x79   :  { %2667 = vmatmul.msk.f32.gmra.mxu3 %vm75_vm0, %v3052_v18  ;;  %2679 = vmatmul.msk.f32.vlgmr.msrb.gmra.mxu0 %vm75_vm0, %v3006_v6 }
  0x7a   :  { %2695 = vmatmul.msk.f32.vlgmr.msrb.gmra.mxu1 %vm75_vm0, %v3006_v6  ;;  %2711 = vmatmul.msk.f32.vlgmr.msrb.gmra.mxu2 %vm75_vm0, %v3006_v6 }
  0x7b   :  { %1597 = vmatpush.msrb.mxu0 %v1580_v20  ;;  %1662 = vmatpush.msrb.mxu1 %v1581_v40  ;;  %v1582_v40 = vld [vmem:[#allocation5 + $0xe8] sm:$0xff] }
  0x7c   :  { %1727 = vmatpush.msrb.mxu2 %v1582_v40 }
  0x81   :  { %2668 = vmatmul.msk.f32.gmra.mxu3 %vm75_vm0, %v3062_v22  ;;  %2680 = vmatmul.msk.f32.gmra.mxu0 %vm75_vm0, %v3018_v11 }
  0x82   :  { %2696 = vmatmul.msk.f32.gmra.mxu1 %vm75_vm0, %v3018_v11  ;;  %2712 = vmatmul.msk.f32.gmra.mxu2 %vm75_vm0, %v3018_v11 }
  0x89   :  { %2669 = vmatmul.msk.f32.gmra.mxu3 %vm75_vm0, %v3072_v23  ;;  %2681 = vmatmul.msk.f32.gmra.mxu0 %vm75_vm0, %v3030_v13 }
  0x8a   :  { %2697 = vmatmul.msk.f32.gmra.mxu1 %vm75_vm0, %v3030_v13  ;;  %2713 = vmatmul.msk.f32.gmra.mxu2 %vm75_vm0, %v3030_v13 }
  0x8e   :  { %v3166_v34 = vpop.f32.mrf.mxu0 }
  0x8f   :  { %v3168_v35 = vpop.f32.mrf.mxu1 }
  0x91   :  { %2670 = vmatmul.msk.f32.gmra.mxu3 %vm75_vm0, %v3082_v24  ;;  %2682 = vmatmul.msk.f32.gmra.mxu0 %vm75_vm0, %v3042_v16 }
  0x92   :  { %2698 = vmatmul.msk.f32.gmra.mxu1 %vm75_vm0, %v3042_v16  ;;  %2714 = vmatmul.msk.f32.gmra.mxu2 %vm75_vm0, %v3042_v16 }
  0x94   :  { %v3178_v36 = vpop.f32.mrf.mxu3 }
  0x95   :  { %v3180_v37 = vpop.f32.mrf.mxu2 }
  0x96   :  { %4522 = vst [vmem:[#allocation11_spill] sm:$0xff] %v3180_v37  ;;  %v3182_v38 = vpop.f32.mrf.mxu0 }
  0x97   :  { %v3184_v39 = vpop.f32.mrf.mxu1 }
  0x99   :  { %2671 = vmatmul.msk.f32.gmra.mxu3 %vm75_vm0, %v3092_v25  ;;  %2683 = vmatmul.msk.f32.gmra.mxu0 %vm75_vm0, %v3052_v18 }
  0x9a   :  { %2699 = vmatmul.msk.f32.gmra.mxu1 %vm75_vm0, %v3052_v18  ;;  %2715 = vmatmul.msk.f32.gmra.mxu2 %vm75_vm0, %v3052_v18 }
  0x9c   :  { %v3194_v41 = vpop.f32.mrf.mxu3 }
  0x9d   :  { %v3196_v42 = vpop.f32.mrf.mxu2 }
  0x9e   :  { %4523 = vst [vmem:[#allocation12_spill] sm:$0xff] %v3196_v42  ;;  %v3198_v43 = vpop.f32.mrf.mxu0 }
  0x9f   :  { %v3200_v44 = vpop.f32.mrf.mxu1 }
  0xa1   :  { %2672 = vmatmul.msk.f32.gmra.mxu3 %vm75_vm0, %v3102_v26  ;;  %2684 = vmatmul.msk.f32.gmra.mxu0 %vm75_vm0, %v3062_v22 }
  0xa2   :  { %2700 = vmatmul.msk.f32.gmra.mxu1 %vm75_vm0, %v3062_v22  ;;  %2716 = vmatmul.msk.f32.gmra.mxu2 %vm75_vm0, %v3062_v22 }
  0xa4   :  { %v3210_v46 = vpop.f32.mrf.mxu3 }
  0xa5   :  { %v3212_v47 = vpop.f32.mrf.mxu2 }
  0xa6   :  { %4524 = vst [vmem:[#allocation13_spill] sm:$0xff] %v3212_v47  ;;  %v3214_v48 = vpop.f32.mrf.mxu0 }
  0xa7   :  { %v3216_v49 = vpop.f32.mrf.mxu1 }
  0xa9   :  { %2673 = vmatmul.msk.f32.gmra.mxu3 %vm75_vm0, %v3112_v28  ;;  %2685 = vmatmul.msk.f32.gmra.mxu0 %vm75_vm0, %v3072_v23 }
  0xaa   :  { %2701 = vmatmul.msk.f32.gmra.mxu1 %vm75_vm0, %v3072_v23  ;;  %2717 = vmatmul.msk.f32.gmra.mxu2 %vm75_vm0, %v3072_v23 }
  0xac   :  { %v3226_v52 = vpop.f32.mrf.mxu3 }
  0xad   :  { %4525 = vst [vmem:[#allocation14_spill] sm:$0xff] %v3226_v52  ;;  %v3228_v53 = vpop.f32.mrf.mxu2 }
  0xae   :  { %4526 = vst [vmem:[#allocation15_spill] sm:$0xff] %v3228_v53  ;;  %v3230_v54 = vpop.f32.mrf.mxu0 }
  0xaf   :  { %v3232_v55 = vpop.f32.mrf.mxu1 }
  0xb1   :  { %2674 = vmatmul.msk.f32.gmra.mxu3 %vm75_vm0, %v3122_v30  ;;  %2686 = vmatmul.msk.f32.gmra.mxu0 %vm75_vm0, %v3082_v24 }
  0xb2   :  { %2702 = vmatmul.msk.f32.gmra.mxu1 %vm75_vm0, %v3082_v24  ;;  %2718 = vmatmul.msk.f32.gmra.mxu2 %vm75_vm0, %v3082_v24 }
  0xb4   :  { %v3242_v56 = vpop.f32.mrf.mxu3 }
  0xb5   :  { %4527 = vst [vmem:[#allocation16_spill] sm:$0xff] %v3242_v56  ;;  %v3244_v57 = vpop.f32.mrf.mxu2 }
  0xb6   :  { %4528 = vst [vmem:[#allocation17_spill] sm:$0xff] %v3244_v57  ;;  %v3246_v58 = vpop.f32.mrf.mxu0 }
  0xb7   :  { %v3248_v59 = vpop.f32.mrf.mxu1 }
  0xb9   :  { %2675 = vmatmul.msk.f32.gmra.mxu3 %vm75_vm0, %v3132_v33  ;;  %2687 = vmatmul.msk.f32.gmra.mxu0 %vm75_vm0, %v3092_v25 }
  0xba   :  { %2703 = vmatmul.msk.f32.gmra.mxu1 %vm75_vm0, %v3092_v25  ;;  %2719 = vmatmul.msk.f32.gmra.mxu2 %vm75_vm0, %v3092_v25 }
  0xbc   :  { %v3258_v60 = vpop.f32.mrf.mxu3 }
  0xbd   :  { %4529 = vst [vmem:[#allocation18_spill] sm:$0xff] %v3258_v60  ;;  %v3260_v61 = vpop.f32.mrf.mxu2 }
  0xbe   :  { %4530 = vst [vmem:[#allocation19_spill] sm:$0xff] %v3260_v61  ;;  %v3262_v62 = vpop.f32.mrf.mxu0 }
  0xbf   :  { %v3264_v63 = vpop.f32.mrf.mxu1 }
  0xc1   :  { %2676 = vmatmul.msk.f32.gmra.mxu3 %vm75_vm0, %v3008_v7  ;;  %2688 = vmatmul.msk.f32.gmra.mxu0 %vm75_vm0, %v3102_v26 }
  0xc2   :  { %2704 = vmatmul.msk.f32.gmra.mxu1 %vm75_vm0, %v3102_v26  ;;  %2720 = vmatmul.msk.f32.gmra.mxu2 %vm75_vm0, %v3102_v26 }
  0xc4   :  { %v3274_v0 = vpop.f32.mrf.mxu3 }
  0xc5   :  { %4531 = vst [vmem:[#allocation20_spill] sm:$0xff] %v3274_v0  ;;  %v3276_v1 = vpop.f32.mrf.mxu2 }
  0xc6   :  { %4532 = vst [vmem:[#allocation21_spill] sm:$0xff] %v3276_v1  ;;  %v3278_v2 = vpop.f32.mrf.mxu0 }
  0xc7   :  { %v3280_v3 = vpop.f32.mrf.mxu1 }
  0xc9   :  { %2677 = vmatmul.msk.f32.gmra.mxu3 %vm75_vm0, %v3020_v12  ;;  %2689 = vmatmul.msk.f32.gmra.mxu0 %vm75_vm0, %v3112_v28 }
  0xca   :  { %2705 = vmatmul.msk.f32.gmra.mxu1 %vm75_vm0, %v3112_v28  ;;  %2721 = vmatmul.msk.f32.gmra.mxu2 %vm75_vm0, %v3112_v28 }
  0xcc   :  { %v3290_v4 = vpop.f32.mrf.mxu3 }
  0xcd   :  { %4533 = vst [vmem:[#allocation22_spill] sm:$0xff] %v3290_v4  ;;  %v3292_v5 = vpop.f32.mrf.mxu2 }
  0xce   :  { %4534 = vst [vmem:[#allocation23_spill] sm:$0xff] %v3292_v5  ;;  %v3294_v8 = vpop.f32.mrf.mxu0 }
  0xcf   :  { %v3296_v9 = vpop.f32.mrf.mxu1 }
  0xd1   :  { %2678 = vmatmul.msk.f32.gmra.mxu3 %vm75_vm0, %v3032_v14  ;;  %2690 = vmatmul.msk.f32.gmra.mxu0 %vm75_vm0, %v3122_v30 }
  0xd2   :  { %2706 = vmatmul.msk.f32.gmra.mxu1 %vm75_vm0, %v3122_v30  ;;  %2722 = vmatmul.msk.f32.gmra.mxu2 %vm75_vm0, %v3122_v30 }
  0xd4   :  { %v3306_v10 = vpop.f32.mrf.mxu3 }
  0xd5   :  { %4535 = vst [vmem:[#allocation24_spill] sm:$0xff] %v3306_v10  ;;  %v3308_v15 = vpop.f32.mrf.mxu2 }
  0xd6   :  { %4536 = vst [vmem:[#allocation25_spill] sm:$0xff] %v3308_v15  ;;  %v3310_v17 = vpop.f32.mrf.mxu0 }
  0xd7   :  { %v3312_v19 = vpop.f32.mrf.mxu1 }
  0xd9   :  { %2691 = vmatmul.msk.f32.gmra.mxu0 %vm75_vm0, %v3132_v33  ;;  %2727 = vmatmul.msk.f32.vlgmr.msra.gmra.mxu3 %vm75_vm0, %v3006_v6 }
  0xda   :  { %2707 = vmatmul.msk.f32.gmra.mxu1 %vm75_vm0, %v3132_v33  ;;  %2723 = vmatmul.msk.f32.gmra.mxu2 %vm75_vm0, %v3132_v33 }
  0xdc   :  { %v343_v21 = vpop.f32.mrf.mxu3 }
  0xdd   :  { %v3322_v27 = vpop.f32.mrf.mxu2  ;;  %v570_v32 = vrot.slane %v343_v21, 1  ;;  %v1163_v21 = vld [vmem:[#allocation5 + $0xb8] sm:$0xff] }
  0xde   :  { %4537 = vst [vmem:[#allocation26_spill] sm:$0xff] %v3322_v27  ;;  %v3324_v29 = vpop.f32.mrf.mxu0  ;;  %1308 = vmatpush.msrb.mxu3 %v1163_v21 }
  0xdf   :  { %v3326_v31 = vpop.f32.mrf.mxu1 }
  0xe0   :  { %4538 = vst [vmem:[#allocation27_spill] sm:$0xff] %v3326_v31 }
  0xe1   :  { %2692 = vmatmul.msk.f32.gmra.mxu0 %vm75_vm0, %v3008_v7  ;;  %2728 = vmatmul.msk.f32.gmra.mxu3 %vm75_vm0, %v3018_v11 }
  0xe2   :  { %2708 = vmatmul.msk.f32.gmra.mxu1 %vm75_vm0, %v3008_v7  ;;  %2724 = vmatmul.msk.f32.gmra.mxu2 %vm75_vm0, %v3008_v7 }
  0xe4   :  { %v346_v45 = vpop.f32.mrf.mxu3 }
  0xe5   :  { %v3336_v50 = vpop.f32.mrf.mxu2  ;;  %v571_v51 = vrot.slane %v346_v45, 1 }
  0xe6   :  { %4539 = vst [vmem:[#allocation28_spill] sm:$0xff] %v3336_v50  ;;  %v3338_v20 = vpop.f32.mrf.mxu0 }
  0xe7   :  { %v572_v10 = vsel %vm569_vm1, %v570_v32, %v571_v51  ;;  %v3341_v4 = vpop.f32.mrf.mxu1  ;;  %v693_v42 = vadd.f32 %v571_v51, %v3182_v38 }
  0xe8   :  { %4540 = vst [vmem:[#allocation29_spill] sm:$0xff] %v3341_v4  ;;  %v690_v56 = vadd.f32 %v572_v10, %v3166_v34 }
  0xe9   :  { %2693 = vmatmul.msk.f32.gmra.mxu0 %vm75_vm0, %v3020_v12  ;;  %2729 = vmatmul.msk.f32.gmra.mxu3 %vm75_vm0, %v3030_v13 }
  0xea   :  { %2709 = vmatmul.msk.f32.gmra.mxu1 %vm75_vm0, %v3020_v12  ;;  %2725 = vmatmul.msk.f32.gmra.mxu2 %vm75_vm0, %v3020_v12 }
  0xec   :  { %v349_v45 = vpop.f32.mrf.mxu3 }
  0xed   :  { %v3351_v32 = vpop.f32.mrf.mxu2  ;;  %v579_v21 = vrot.slane %v349_v45, 1 }
  0xee   :  { %4541 = vst [vmem:[#allocation30_spill] sm:$0xff] %v3351_v32  ;;  %v3353_v0 = vpop.f32.mrf.mxu0 }
  0xef   :  { %v3355_v50 = vpop.f32.mrf.mxu1 }
  0xf0   :  { %4542 = vst [vmem:[#allocation31_spill] sm:$0xff] %v3355_v50 }
  0xf1   :  { %2694 = vmatmul.msk.f32.gmra.mxu0 %vm75_vm0, %v3032_v14  ;;  %2730 = vmatmul.msk.f32.gmra.mxu3 %vm75_vm0, %v3042_v16 }
  0xf2   :  { %2710 = vmatmul.msk.f32.gmra.mxu1 %vm75_vm0, %v3032_v14  ;;  %2726 = vmatmul.msk.f32.gmra.mxu2 %vm75_vm0, %v3032_v14 }
  0xf4   :  { %v352_v40 = vpop.f32.mrf.mxu3 }
  0xf5   :  { %v3365_v15 = vpop.f32.mrf.mxu2  ;;  %v580_v32 = vrot.slane %v352_v40, 1 }
  0xf6   :  { %4543 = vst [vmem:[#allocation32_spill] sm:$0xff] %v3365_v15  ;;  %v3367_v27 = vpop.f32.mrf.mxu0 }
  0xf7   :  { %v581_v1 = vsel %vm569_vm1, %v579_v21, %v580_v32  ;;  %v3370_v5 = vpop.f32.mrf.mxu1  ;;  %v699_v10 = vadd.f32 %v580_v32, %v3214_v48 }
  0xf8   :  { %4544 = vst [vmem:[#allocation33_spill] sm:$0xff] %v3370_v5 }
  0xf9   :  { %2731 = vmatmul.msk.f32.gmra.mxu3 %vm75_vm0, %v3052_v18  ;;  %2743 = vmatmul.msk.f32.vlgmr.msra.gmra.mxu0 %vm75_vm0, %v3006_v6 }
  0xfa   :  { %2759 = vmatmul.msk.f32.vlgmr.msra.gmra.mxu1 %vm75_vm0, %v3006_v6  ;;  %2775 = vmatmul.msk.f32.vlgmr.msra.gmra.mxu2 %vm75_vm0, %v3006_v6 }
  0xfc   :  { %v355_v45 = vpop.f32.mrf.mxu3 }
  0xfd   :  { %v762_v40 = vpop.f32.mrf.mxu2  ;;  %v588_v21 = vrot.slane %v355_v45, 1 }
  0xfe   :  { %v3380_v15 = vpop.f32.mrf.mxu0  ;;  %v989_v61 = vrot.slane %v762_v40, 2 }
  0xff   :  { %v3382_v57 = vpop.f32.mrf.mxu1 }
 0x100   :  { %4545 = vst [vmem:[#allocation34_spill] sm:$0xff] %v3382_v57 }
 0x101   :  { %2732 = vmatmul.msk.f32.gmra.mxu3 %vm75_vm0, %v3062_v22  ;;  %2744 = vmatmul.msk.f32.gmra.mxu0 %vm75_vm0, %v3018_v11 }
 0x102   :  { %2760 = vmatmul.msk.f32.gmra.mxu1 %vm75_vm0, %v3018_v11  ;;  %2776 = vmatmul.msk.f32.gmra.mxu2 %vm75_vm0, %v3018_v11 }
 0x104   :  { %v358_v53 = vpop.f32.mrf.mxu3 }
 0x105   :  { %v589_v47 = vrot.slane %v358_v53, 1  ;;  %v765_v37 = vpop.f32.mrf.mxu2 }
 0x106   :  { %v990_v57 = vrot.slane %v765_v37, 2  ;;  %v3393_v5 = vpop.f32.mrf.mxu0 }
 0x107   :  { %v590_v60 = vsel %vm569_vm1, %v588_v21, %v589_v47  ;;  %v3397_v50 = vpop.f32.mrf.mxu1  ;;  %v696_v21 = vadd.f32 %v581_v1, %v3198_v43  ;;  %v1577_v43 = vld [vmem:[#allocation5 + $0xc0] sm:$0xff] }
 0x108   :  { %4546 = vst [vmem:[#allocation35_spill] sm:$0xff] %v3397_v50  ;;  %v991_v52 = vsel %vm988_vm2, %v989_v61, %v990_v57  ;;  %v3400_v31 = vadd.f32 %v990_v57, %v693_v42  ;;  %1598 = vmatpush.msrb.mxu0 %v1577_v43 }
 0x109   :  { %v3402_v45 = vadd.f32 %v991_v52, %v690_v56  ;;  %2733 = vmatmul.msk.f32.gmra.mxu3 %vm75_vm0, %v3072_v23  ;;  %2745 = vmatmul.msk.f32.gmra.mxu0 %vm75_vm0, %v3030_v13 }
 0x10a   :  { %4547 = vst [vmem:[#allocation36_spill] sm:$0xff] %v3400_v31  ;;  %2761 = vmatmul.msk.f32.gmra.mxu1 %vm75_vm0, %v3030_v13  ;;  %2777 = vmatmul.msk.f32.gmra.mxu2 %vm75_vm0, %v3030_v13 }
 0x10b   :  { %4548 = vst [vmem:[#allocation37_spill] sm:$0xff] %v3402_v45 }
 0x10c   :  { %v361_v34 = vpop.f32.mrf.mxu3 }
 0x10d   :  { %v768_v37 = vpop.f32.mrf.mxu2  ;;  %v597_v52 = vrot.slane %v361_v34, 1 }
 0x10e   :  { %v3412_v38 = vpop.f32.mrf.mxu0  ;;  %v998_v53 = vrot.slane %v768_v37, 2 }
 0x10f   :  { %v3414_v42 = vpop.f32.mrf.mxu1 }
 0x110   :  { %4549 = vst [vmem:[#allocation38_spill] sm:$0xff] %v3414_v42 }
 0x111   :  { %2734 = vmatmul.msk.f32.gmra.mxu3 %vm75_vm0, %v3082_v24  ;;  %2746 = vmatmul.msk.f32.gmra.mxu0 %vm75_vm0, %v3042_v16 }
 0x112   :  { %2762 = vmatmul.msk.f32.gmra.mxu1 %vm75_vm0, %v3042_v16  ;;  %2778 = vmatmul.msk.f32.gmra.mxu2 %vm75_vm0, %v3042_v16 }
 0x114   :  { %v3424_v56 = vpop.f32.mrf.mxu3 }
 0x115   :  { %v598_v57 = vrot.slane %v3424_v56, 1  ;;  %v771_v61 = vpop.f32.mrf.mxu2 }
 0x116   :  { %v999_v51 = vrot.slane %v771_v61, 2  ;;  %v3428_v40 = vpop.f32.mrf.mxu0 }
 0x117   :  { %v599_v42 = vsel %vm569_vm1, %v597_v52, %v598_v57  ;;  %v3432_v50 = vpop.f32.mrf.mxu1 }
 0x118   :  { %4550 = vst [vmem:[#allocation39_spill] sm:$0xff] %v3432_v50  ;;  %v1000_v45 = vsel %vm988_vm2, %v998_v53, %v999_v51  ;;  %v3435_v34 = vadd.f32 %v999_v51, %v699_v10  ;;  %v1578_v53 = vld [vmem:[#allocation5 + $0xc8] sm:$0xff]  ;;  %v702_v50 = vadd.f32 %v590_v60, %v3230_v54  ;;  %v1579_v54 = vld [vmem:[#allocation5 + $0xd0] sm:$0xff] }
 0x119   :  { %v3437_v37 = vadd.f32 %v1000_v45, %v696_v21  ;;  %2735 = vmatmul.msk.f32.gmra.mxu3 %vm75_vm0, %v3092_v25  ;;  %2747 = vmatmul.msk.f32.gmra.mxu0 %vm75_vm0, %v3052_v18  ;;  %v705_v21 = vadd.f32 %v589_v47, %v3246_v58  ;;  %v1160_v47 = vld [vmem:[#allocation5 + $0xa0] sm:$0xff] }
 0x11a   :  { %4551 = vst [vmem:[#allocation40_spill] sm:$0xff] %v3435_v34  ;;  %2763 = vmatmul.msk.f32.gmra.mxu1 %vm75_vm0, %v3052_v18  ;;  %2779 = vmatmul.msk.f32.gmra.mxu2 %vm75_vm0, %v3052_v18 }
 0x11b   :  { %4552 = vst [vmem:[#allocation41_spill] sm:$0xff] %v3437_v37  ;;  %1663 = vmatpush.msrb.mxu1 %v1578_v53  ;;  %1309 = vmatpush.msrb.mxu3 %v1160_v47 }
 0x11c   :  { %v367_v48 = vpop.f32.mrf.mxu3  ;;  %1728 = vmatpush.msrb.mxu2 %v1579_v54  ;;  %v708_v54 = vadd.f32 %v599_v42, %v3262_v62 }
 0x11d   :  { %v774_v1 = vpop.f32.mrf.mxu2  ;;  %v606_v52 = vrot.slane %v367_v48, 1 }
 0x11e   :  { %v3447_v32 = vpop.f32.mrf.mxu0  ;;  %v1007_v56 = vrot.slane %v774_v1, 2 }
 0x11f   :  { %v3449_v45 = vpop.f32.mrf.mxu1 }
 0x120   :  { %4553 = vst [vmem:[#allocation42_spill] sm:$0xff] %v3449_v45 }
 0x121   :  { %2736 = vmatmul.msk.f32.gmra.mxu3 %vm75_vm0, %v3102_v26  ;;  %2748 = vmatmul.msk.f32.gmra.mxu0 %vm75_vm0, %v3062_v22 }
 0x122   :  { %2764 = vmatmul.msk.f32.gmra.mxu1 %vm75_vm0, %v3062_v22  ;;  %2780 = vmatmul.msk.f32.gmra.mxu2 %vm75_vm0, %v3062_v22 }
 0x124   :  { %v370_v61 = vpop.f32.mrf.mxu3 }
 0x125   :  { %v607_v10 = vrot.slane %v370_v61, 1  ;;  %v777_v51 = vpop.f32.mrf.mxu2 }
 0x126   :  { %v1008_v43 = vrot.slane %v777_v51, 2  ;;  %v3460_v45 = vpop.f32.mrf.mxu0 }
 0x127   :  { %v608_v34 = vsel %vm569_vm1, %v606_v52, %v607_v10  ;;  %v3464_v37 = vpop.f32.mrf.mxu1 }
 0x128   :  { %4554 = vst [vmem:[#allocation43_spill] sm:$0xff] %v3464_v37  ;;  %v1009_v31 = vsel %vm988_vm2, %v1007_v56, %v1008_v43  ;;  %v3467_v48 = vadd.f32 %v1008_v43, %v705_v21  ;;  %v711_v21 = vadd.f32 %v598_v57, %v3278_v2 }
 0x129   :  { %v3469_v1 = vadd.f32 %v1009_v31, %v702_v50  ;;  %2737 = vmatmul.msk.f32.gmra.mxu3 %vm75_vm0, %v3112_v28  ;;  %2749 = vmatmul.msk.f32.gmra.mxu0 %vm75_vm0, %v3072_v23 }
 0x12a   :  { %4555 = vst [vmem:[#allocation44_spill] sm:$0xff] %v3467_v48  ;;  %2765 = vmatmul.msk.f32.gmra.mxu1 %vm75_vm0, %v3072_v23  ;;  %2781 = vmatmul.msk.f32.gmra.mxu2 %vm75_vm0, %v3072_v23 }
 0x12b   :  { %4556 = vst [vmem:[#allocation45_spill] sm:$0xff] %v3469_v1 }
 0x12c   :  { %v373_v58 = vpop.f32.mrf.mxu3 }
 0x12d   :  { %v780_v60 = vpop.f32.mrf.mxu2  ;;  %v615_v52 = vrot.slane %v373_v58, 1 }
 0x12e   :  { %v3479_v31 = vpop.f32.mrf.mxu0  ;;  %v1016_v53 = vrot.slane %v780_v60, 2 }
 0x12f   :  { %v3481_v50 = vpop.f32.mrf.mxu1 }
 0x130   :  { %4557 = vst [vmem:[#allocation46_spill] sm:$0xff] %v3481_v50 }
 0x131   :  { %2738 = vmatmul.msk.f32.gmra.mxu3 %vm75_vm0, %v3122_v30  ;;  %2750 = vmatmul.msk.f32.gmra.mxu0 %vm75_vm0, %v3082_v24 }
 0x132   :  { %2766 = vmatmul.msk.f32.gmra.mxu1 %vm75_vm0, %v3082_v24  ;;  %2782 = vmatmul.msk.f32.gmra.mxu2 %vm75_vm0, %v3082_v24 }
 0x134   :  { %v376_v56 = vpop.f32.mrf.mxu3 }
 0x135   :  { %v616_v61 = vrot.slane %v376_v56, 1  ;;  %v783_v51 = vpop.f32.mrf.mxu2 }
 0x136   :  { %v1017_v43 = vrot.slane %v783_v51, 2  ;;  %v3492_v47 = vpop.f32.mrf.mxu0  ;;  %v717_v51 = vadd.f32 %v607_v10, %v3310_v17 }
 0x137   :  { %v617_v48 = vsel %vm569_vm1, %v615_v52, %v616_v61  ;;  %v3496_v1 = vpop.f32.mrf.mxu1 }
 0x138   :  { %4558 = vst [vmem:[#allocation47_spill] sm:$0xff] %v3496_v1  ;;  %v1018_v50 = vsel %vm988_vm2, %v1016_v53, %v1017_v43  ;;  %v3499_v37 = vadd.f32 %v1017_v43, %v711_v21 }
 0x139   :  { %v3501_v58 = vadd.f32 %v1018_v50, %v708_v54  ;;  %2739 = vmatmul.msk.f32.gmra.mxu3 %vm75_vm0, %v3132_v33  ;;  %2751 = vmatmul.msk.f32.gmra.mxu0 %vm75_vm0, %v3092_v25  ;;  %v714_v54 = vadd.f32 %v608_v34, %v3294_v8 }
 0x13a   :  { %4559 = vst [vmem:[#allocation48_spill] sm:$0xff] %v3499_v37  ;;  %2767 = vmatmul.msk.f32.gmra.mxu1 %vm75_vm0, %v3092_v25  ;;  %2783 = vmatmul.msk.f32.gmra.mxu2 %vm75_vm0, %v3092_v25 }
 0x13b   :  { %4560 = vst [vmem:[#allocation49_spill] sm:$0xff] %v3501_v58 }
 0x13c   :  { %v379_v62 = vpop.f32.mrf.mxu3 }
 0x13d   :  { %v786_v2 = vpop.f32.mrf.mxu2  ;;  %v624_v60 = vrot.slane %v379_v62, 1 }
 0x13e   :  { %v3511_v42 = vpop.f32.mrf.mxu0  ;;  %v1025_v50 = vrot.slane %v786_v2, 2 }
 0x13f   :  { %v3513_v57 = vpop.f32.mrf.mxu1 }
 0x140   :  { %4561 = vst [vmem:[#allocation50_spill] sm:$0xff] %v3513_v57 }
 0x141   :  { %2740 = vmatmul.msk.f32.gmra.mxu3 %vm75_vm0, %v3008_v7  ;;  %2752 = vmatmul.msk.f32.gmra.mxu0 %vm75_vm0, %v3102_v26 }
 0x142   :  { %2768 = vmatmul.msk.f32.gmra.mxu1 %vm75_vm0, %v3102_v26  ;;  %2784 = vmatmul.msk.f32.gmra.mxu2 %vm75_vm0, %v3102_v26 }
 0x144   :  { %v382_v52 = vpop.f32.mrf.mxu3 }
 0x145   :  { %v625_v53 = vrot.slane %v382_v52, 1  ;;  %v789_v56 = vpop.f32.mrf.mxu2 }
 0x146   :  { %v1026_v21 = vrot.slane %v789_v56, 2  ;;  %v3524_v43 = vpop.f32.mrf.mxu0  ;;  %v723_v56 = vadd.f32 %v616_v61, %v3338_v20 }
 0x147   :  { %4562 = vst [vmem:[#allocation51_spill] sm:$0xff] %v3524_v43  ;;  %v626_v57 = vsel %vm569_vm1, %v624_v60, %v625_v53  ;;  %v3528_v1 = vpop.f32.mrf.mxu1 }
 0x148   :  { %4563 = vst [vmem:[#allocation52_spill] sm:$0xff] %v3528_v1  ;;  %v1027_v37 = vsel %vm988_vm2, %v1025_v50, %v1026_v21  ;;  %v3531_v58 = vadd.f32 %v1026_v21, %v717_v51 }
 0x149   :  { %v3533_v62 = vadd.f32 %v1027_v37, %v714_v54  ;;  %2741 = vmatmul.msk.f32.gmra.mxu3 %vm75_vm0, %v3020_v12  ;;  %2753 = vmatmul.msk.f32.gmra.mxu0 %vm75_vm0, %v3112_v28  ;;  %v720_v54 = vadd.f32 %v617_v48, %v3324_v29 }
 0x14a   :  { %2769 = vmatmul.msk.f32.gmra.mxu1 %vm75_vm0, %v3112_v28  ;;  %2785 = vmatmul.msk.f32.gmra.mxu2 %vm75_vm0, %v3112_v28 }
 0x14c   :  { %v385_v8 = vpop.f32.mrf.mxu3 }
 0x14d   :  { %v792_v17 = vpop.f32.mrf.mxu2  ;;  %v633_v37 = vrot.slane %v385_v8, 1 }
 0x14e   :  { %v3543_v34 = vpop.f32.mrf.mxu0  ;;  %v1034_v2 = vrot.slane %v792_v17, 2 }
 0x14f   :  { %v3545_v10 = vpop.f32.mrf.mxu1 }
 0x150   :  { %4564 = vst [vmem:[#allocation53_spill] sm:$0xff] %v3545_v10 }
 0x151   :  { %2742 = vmatmul.msk.f32.gmra.mxu3 %vm75_vm0, %v3032_v14  ;;  %2754 = vmatmul.msk.f32.gmra.mxu0 %vm75_vm0, %v3122_v30 }
 0x152   :  { %2770 = vmatmul.msk.f32.gmra.mxu1 %vm75_vm0, %v3122_v30  ;;  %2786 = vmatmul.msk.f32.gmra.mxu2 %vm75_vm0, %v3122_v30 }
 0x154   :  { %v388_v60 = vpop.f32.mrf.mxu3 }
 0x155   :  { %v634_v50 = vrot.slane %v388_v60, 1  ;;  %v795_v52 = vpop.f32.mrf.mxu2 }
 0x156   :  { %v1035_v51 = vrot.slane %v795_v52, 2  ;;  %v3556_v21 = vpop.f32.mrf.mxu0  ;;  %v729_v52 = vadd.f32 %v625_v53, %v3178_v36 }
 0x157   :  { %4565 = vst [vmem:[#allocation54_spill] sm:$0xff] %v3556_v21  ;;  %v635_v10 = vsel %vm569_vm1, %v633_v37, %v634_v50  ;;  %v3560_v1 = vpop.f32.mrf.mxu1 }
 0x158   :  { %4566 = vst [vmem:[#allocation55_spill] sm:$0xff] %v3560_v1  ;;  %v1036_v4 = vsel %vm988_vm2, %v1034_v2, %v1035_v51  ;;  %v3563_v43 = vadd.f32 %v1035_v51, %v723_v56 }
 0x159   :  { %v3565_v8 = vadd.f32 %v1036_v4, %v720_v54  ;;  %2755 = vmatmul.msk.f32.gmra.mxu0 %vm75_vm0, %v3132_v33  ;;  %2791 = vmatmul.msk.f32.vlgmr.msrb.gmra.mxu3 %vm75_vm0, %v3006_v6  ;;  %v726_v54 = vadd.f32 %v626_v57, %v3353_v0 }
 0x15a   :  { %2771 = vmatmul.msk.f32.gmra.mxu1 %vm75_vm0, %v3132_v33  ;;  %2787 = vmatmul.msk.f32.gmra.mxu2 %vm75_vm0, %v3132_v33 }
 0x15c   :  { %v827_v29 = vpop.f32.mrf.mxu3 }
 0x15d   :  { %v798_v20 = vpop.f32.mrf.mxu2  ;;  %v992_v4 = vrot.slane %v827_v29, 2 }
 0x15e   :  { %v3575_v48 = vpop.f32.mrf.mxu0  ;;  %v1043_v17 = vrot.slane %v798_v20, 2 }
 0x15f   :  { %4567 = vst [vmem:[#allocation56_spill] sm:$0xff] %v3575_v48  ;;  %v3577_v61 = vpop.f32.mrf.mxu1 }
 0x160   :  { %4568 = vst [vmem:[#allocation57_spill] sm:$0xff] %v3577_v61 }
 0x161   :  { %2756 = vmatmul.msk.f32.gmra.mxu0 %vm75_vm0, %v3008_v7  ;;  %2792 = vmatmul.msk.f32.gmra.mxu3 %vm75_vm0, %v3018_v11 }
 0x162   :  { %2772 = vmatmul.msk.f32.gmra.mxu1 %vm75_vm0, %v3008_v7  ;;  %2788 = vmatmul.msk.f32.gmra.mxu2 %vm75_vm0, %v3008_v7 }
 0x164   :  { %v830_v37 = vpop.f32.mrf.mxu3 }
 0x165   :  { %v801_v2 = vpop.f32.mrf.mxu2  ;;  %v993_v60 = vrot.slane %v830_v37, 2 }
 0x166   :  { %v1044_v56 = vrot.slane %v801_v2, 2  ;;  %v3588_v51 = vpop.f32.mrf.mxu0 }
 0x167   :  { %v994_v61 = vsel %vm988_vm2, %v992_v4, %v993_v60  ;;  %v3592_v1 = vpop.f32.mrf.mxu1 }
 0x168   :  { %4569 = vst [vmem:[#allocation58_spill] sm:$0xff] %v3592_v1  ;;  %v1045_v21 = vsel %vm988_vm2, %v1043_v17, %v1044_v56  ;;  %v3595_v48 = vadd.f32 %v1044_v56, %v729_v52  ;;  %v735_v17 = vadd.f32 %v634_v50, %v3210_v46  ;;  %v732_v52 = vadd.f32 %v635_v10, %v3194_v41 }
 0x169   :  { %v3597_v7 = vadd.f32 %v1045_v21, %v726_v54  ;;  %2757 = vmatmul.msk.f32.gmra.mxu0 %vm75_vm0, %v3020_v12  ;;  %2793 = vmatmul.msk.f32.gmra.mxu3 %vm75_vm0, %v3030_v13  ;;  %v574_v10 = vrot.slane %v3380_v15, 1 }
 0x16a   :  { %2773 = vmatmul.msk.f32.gmra.mxu1 %vm75_vm0, %v3020_v12  ;;  %2789 = vmatmul.msk.f32.gmra.mxu2 %vm75_vm0, %v3020_v12 }
 0x16b   :  { %v694_v15 = vadd.f32 %v574_v10, %v3184_v39 }
 0x16c   :  { %v833_v36 = vpop.f32.mrf.mxu3 }
 0x16d   :  { %v804_v0 = vpop.f32.mrf.mxu2  ;;  %v1001_v21 = vrot.slane %v833_v36, 2 }
 0x16e   :  { %v3607_v57 = vpop.f32.mrf.mxu0  ;;  %v1052_v12 = vrot.slane %v804_v0, 2 }
 0x16f   :  { %v3609_v53 = vpop.f32.mrf.mxu1 }
 0x170   :  { %4570 = vst [vmem:[#allocation59_spill] sm:$0xff] %v3609_v53 }
 0x171   :  { %2758 = vmatmul.msk.f32.gmra.mxu0 %vm75_vm0, %v3032_v14  ;;  %2794 = vmatmul.msk.f32.gmra.mxu3 %vm75_vm0, %v3042_v16 }
 0x172   :  { %2774 = vmatmul.msk.f32.gmra.mxu1 %vm75_vm0, %v3032_v14  ;;  %2790 = vmatmul.msk.f32.gmra.mxu2 %vm75_vm0, %v3032_v14 }
 0x174   :  { %v3619_v29 = vpop.f32.mrf.mxu3 }
 0x175   :  { %v807_v20 = vpop.f32.mrf.mxu2  ;;  %v4510_v4 = vrot.slane %v3619_v29, 2 }
 0x176   :  { %v1053_v37 = vrot.slane %v807_v20, 2  ;;  %v3623_v2 = vpop.f32.mrf.mxu0 }
 0x177   :  { %v1003_v56 = vsel %vm988_vm2, %v1001_v21, %v4510_v4  ;;  %v3629_v54 = vpop.f32.mrf.mxu1  ;;  %v1113_v4 = vadd.f32 %v993_v60, %v694_v15 }
 0x178   :  { %v1054_v14 = vsel %vm988_vm2, %v1052_v12, %v1053_v37  ;;  %v3632_v36 = vadd.f32 %v1053_v37, %v735_v17  ;;  %v573_v12 = vrot.slane %v3367_v27, 1 }
 0x179   :  { %v3634_v0 = vadd.f32 %v1054_v14, %v732_v52  ;;  %2795 = vmatmul.msk.f32.gmra.mxu3 %vm75_vm0, %v3052_v18  ;;  %2807 = vmatmul.msk.f32.vlgmr.msrb.gmra.mxu0 %vm75_vm0, %v3006_v6 }
 0x17a   :  { %2823 = vmatmul.msk.f32.vlgmr.msrb.gmra.mxu1 %vm75_vm0, %v3006_v6  ;;  %2839 = vmatmul.msk.f32.vlgmr.msrb.gmra.mxu2 %vm75_vm0, %v3006_v6  ;;  %v575_v20 = vsel %vm569_vm1, %v573_v12, %v574_v10  ;;  %v583_v10 = vrot.slane %v3412_v38, 1 }
 0x17b   :  { %v691_v27 = vadd.f32 %v575_v20, %v3168_v35 }
 0x17c   :  { %v839_v41 = vpop.f32.mrf.mxu3  ;;  %v700_v38 = vadd.f32 %v583_v10, %v3216_v49 }
 0x17d   :  { %v1246_v46 = vpop.f32.mrf.mxu2  ;;  %v1010_v6 = vrot.slane %v839_v41, 2  ;;  %v1110_v1 = vadd.f32 %v994_v61, %v691_v27 }
 0x17e   :  { %v3645_v50 = vpop.f32.mrf.mxu0  ;;  %v1411_v17 = vrot.slane %v1246_v46, 3 }
 0x17f   :  { %v3647_v21 = vpop.f32.mrf.mxu1 }
 0x181   :  { %2796 = vmatmul.msk.f32.gmra.mxu3 %vm75_vm0, %v3062_v22  ;;  %2808 = vmatmul.msk.f32.gmra.mxu0 %vm75_vm0, %v3018_v11 }
 0x182   :  { %2824 = vmatmul.msk.f32.gmra.mxu1 %vm75_vm0, %v3018_v11  ;;  %2840 = vmatmul.msk.f32.gmra.mxu2 %vm75_vm0, %v3018_v11 }
 0x184   :  { %v3660_v37 = vpop.f32.mrf.mxu3 }
 0x185   :  { %v4511_v52 = vrot.slane %v3660_v37, 2  ;;  %v1249_v14 = vpop.f32.mrf.mxu2 }
 0x186   :  { %v1412_v53 = vrot.slane %v1249_v14, 3  ;;  %v3664_v12 = vpop.f32.mrf.mxu0  ;;  %v4572_v14 = vrot.slane %v3619_v29, 2 }
 0x187   :  { %4571 = vst [vmem:[#allocation60_spill] sm:$0xff] %v3664_v12  ;;  %v1012_v11 = vsel %vm988_vm2, %v1010_v6, %v4511_v52  ;;  %v3669_v41 = vpop.f32.mrf.mxu1 }
 0x188   :  { %v1413_v39 = vsel %vm1407_vm3, %v1411_v17, %v1412_v53  ;;  %v3672_v46 = vadd.f32 %v1412_v53, %v1113_v4  ;;  %v582_v4 = vrot.slane %v3393_v5, 1 }
 0x189   :  { %v3674_v35 = vadd.f32 %v1413_v39, %v1110_v1  ;;  %2797 = vmatmul.msk.f32.gmra.mxu3 %vm75_vm0, %v3072_v23  ;;  %2809 = vmatmul.msk.f32.gmra.mxu0 %vm75_vm0, %v3030_v13  ;;  %v1119_v39 = vadd.f32 %v4572_v14, %v700_v38 }
 0x18a   :  { %2825 = vmatmul.msk.f32.gmra.mxu1 %vm75_vm0, %v3030_v13  ;;  %2841 = vmatmul.msk.f32.gmra.mxu2 %vm75_vm0, %v3030_v13  ;;  %v584_v20 = vsel %vm569_vm1, %v582_v4, %v583_v10 }
 0x18b   :  { %v697_v5 = vadd.f32 %v584_v20, %v3200_v44 }
 0x18c   :  { %v845_v61 = vpop.f32.mrf.mxu3 }
 0x18d   :  { %v1252_v60 = vpop.f32.mrf.mxu2  ;;  %v1019_v13 = vrot.slane %v845_v61, 2  ;;  %v1116_v12 = vadd.f32 %v1003_v56, %v697_v5  ;;  %v592_v56 = vrot.slane %v3447_v32, 1 }
 0x18e   :  { %v3685_v53 = vpop.f32.mrf.mxu0  ;;  %v1420_v6 = vrot.slane %v1252_v60, 3 }
 0x18f   :  { %v3687_v1 = vpop.f32.mrf.mxu1 }
 0x191   :  { %2798 = vmatmul.msk.f32.gmra.mxu3 %vm75_vm0, %v3082_v24  ;;  %2810 = vmatmul.msk.f32.gmra.mxu0 %vm75_vm0, %v3042_v16 }
 0x192   :  { %2826 = vmatmul.msk.f32.gmra.mxu1 %vm75_vm0, %v3042_v16  ;;  %2842 = vmatmul.msk.f32.gmra.mxu2 %vm75_vm0, %v3042_v16 }
 0x194   :  { %v3700_v15 = vpop.f32.mrf.mxu3 }
 0x195   :  { %v1020_v17 = vrot.slane %v3700_v15, 2  ;;  %v1255_v27 = vpop.f32.mrf.mxu2 }
 0x196   :  { %v1421_v4 = vrot.slane %v1255_v27, 3  ;;  %v3706_v52 = vpop.f32.mrf.mxu0 }
 0x197   :  { %v1021_v16 = vsel %vm988_vm2, %v1019_v13, %v1020_v17  ;;  %v3709_v61 = vpop.f32.mrf.mxu1 }
 0x198   :  { %v1422_v49 = vsel %vm1407_vm3, %v1420_v6, %v1421_v4  ;;  %v3712_v60 = vadd.f32 %v1421_v4, %v1119_v39 }
 0x199   :  { %v3714_v10 = vadd.f32 %v1422_v49, %v1116_v12  ;;  %2799 = vmatmul.msk.f32.gmra.mxu3 %vm75_vm0, %v3092_v25  ;;  %2811 = vmatmul.msk.f32.gmra.mxu0 %vm75_vm0, %v3052_v18  ;;  %v591_v25 = vrot.slane %v3428_v40, 1 }
 0x19a   :  { %2827 = vmatmul.msk.f32.gmra.mxu1 %vm75_vm0, %v3052_v18  ;;  %2843 = vmatmul.msk.f32.gmra.mxu2 %vm75_vm0, %v3052_v18  ;;  %v706_v18 = vadd.f32 %v592_v56, %v3248_v59 }
 0x19b   :  { %v593_v13 = vsel %vm569_vm1, %v591_v25, %v592_v56  ;;  %v600_v56 = vrot.slane %v3460_v45, 1 }
 0x19c   :  { %v3724_v44 = vpop.f32.mrf.mxu3  ;;  %v703_v40 = vadd.f32 %v593_v13, %v3232_v55 }
 0x19d   :  { %v1258_v29 = vpop.f32.mrf.mxu2 }
 0x19e   :  { %v3727_v20 = vpop.f32.mrf.mxu0  ;;  %v1429_v32 = vrot.slane %v1258_v29, 3  ;;  %v1122_v14 = vadd.f32 %v1012_v11, %v703_v40  ;;  %v601_v11 = vrot.slane %v3479_v31, 1 }
 0x19f   :  { %v3729_v12 = vpop.f32.mrf.mxu1 }
 0x1a0   :  { %v712_v31 = vadd.f32 %v601_v11, %v3280_v3 }
 0x1a1   :  { %2800 = vmatmul.msk.f32.gmra.mxu3 %vm75_vm0, %v3102_v26  ;;  %2812 = vmatmul.msk.f32.gmra.mxu0 %vm75_vm0, %v3062_v22  ;;  %v4573_v26 = vrot.slane %v3660_v37, 2 }
 0x1a2   :  { %2828 = vmatmul.msk.f32.gmra.mxu1 %vm75_vm0, %v3062_v22  ;;  %2844 = vmatmul.msk.f32.gmra.mxu2 %vm75_vm0, %v3062_v22 }
 0x1a3   :  { %v1125_v15 = vadd.f32 %v4573_v26, %v706_v18 }
 0x1a4   :  { %v3742_v38 = vpop.f32.mrf.mxu3 }
 0x1a5   :  { %v1261_v6 = vpop.f32.mrf.mxu2 }
 0x1a6   :  { %v1430_v5 = vrot.slane %v1261_v6, 3  ;;  %v3747_v27 = vpop.f32.mrf.mxu0 }
 0x1a7   :  { %v3749_v39 = vpop.f32.mrf.mxu1 }
 0x1a8   :  { %v1431_v4 = vsel %vm1407_vm3, %v1429_v32, %v1430_v5  ;;  %v3752_v22 = vadd.f32 %v1430_v5, %v1125_v15  ;;  %v1131_v32 = vadd.f32 %v1020_v17, %v712_v31  ;;  %v1029_v31 = vrot.slane %v3742_v38, 2 }
 0x1a9   :  { %v3754_v59 = vadd.f32 %v1431_v4, %v1122_v14  ;;  %2801 = vmatmul.msk.f32.gmra.mxu3 %vm75_vm0, %v3112_v28  ;;  %2813 = vmatmul.msk.f32.gmra.mxu0 %vm75_vm0, %v3072_v23  ;;  %v602_v28 = vsel %vm569_vm1, %v600_v56, %v601_v11  ;;  %v610_v4 = vrot.slane %v3511_v42, 1  ;;  %v3811_v42 = vld [vmem:[#allocation2 + $0x68] sm:$0xff] }
 0x1aa   :  { %2829 = vmatmul.msk.f32.gmra.mxu1 %vm75_vm0, %v3072_v23  ;;  %2845 = vmatmul.msk.f32.gmra.mxu2 %vm75_vm0, %v3072_v23  ;;  %v709_v45 = vadd.f32 %v602_v28, %v3264_v63  ;;  %v2874_v63 = vld [vmem:[#allocation2 + $0x40] sm:$0xff] }
 0x1ac   :  { %v857_v55 = vpop.f32.mrf.mxu3  ;;  %v1128_v26 = vadd.f32 %v1021_v16, %v709_v45 }
 0x1ad   :  { %v1264_v37 = vpop.f32.mrf.mxu2  ;;  %v1037_v23 = vrot.slane %v857_v55, 2 }
 0x1ae   :  { %v3765_v49 = vpop.f32.mrf.mxu0  ;;  %v1438_v25 = vrot.slane %v1264_v37, 3 }
 0x1af   :  { %v3767_v29 = vpop.f32.mrf.mxu1 }
 0x1b1   :  { %2802 = vmatmul.msk.f32.gmra.mxu3 %vm75_vm0, %v3122_v30  ;;  %2814 = vmatmul.msk.f32.gmra.mxu0 %vm75_vm0, %v3082_v24 }
 0x1b2   :  { %2830 = vmatmul.msk.f32.gmra.mxu1 %vm75_vm0, %v3082_v24  ;;  %2846 = vmatmul.msk.f32.gmra.mxu2 %vm75_vm0, %v3082_v24 }
 0x1b4   :  { %v3780_v13 = vpop.f32.mrf.mxu3 }
 0x1b5   :  { %v4515_v30 = vrot.slane %v3780_v13, 2  ;;  %v1267_v18 = vpop.f32.mrf.mxu2 }
 0x1b6   :  { %v1439_v40 = vrot.slane %v1267_v18, 3  ;;  %v916_v6 = vpop.f32.mrf.mxu0  ;;  %v2876_v18 = vld [vmem:[#allocation2 + $0x48] sm:$0xff] }
 0x1b7   :  { %v3787_v15 = vsel %vm988_vm2, %v1037_v23, %v4515_v30  ;;  %v1205_v24 = vpop.f32.mrf.mxu1  ;;  %v1031_v11 = vrot.slane %v916_v6, 2  ;;  %v1028_v23 = vrot.slane %v3724_v44, 2  ;;  %v718_v6 = vadd.f32 %v610_v4, %v3312_v19 }
 0x1b8   :  { %v1440_v3 = vsel %vm1407_vm3, %v1438_v25, %v1439_v40  ;;  %v3790_v5 = vadd.f32 %v1439_v40, %v1131_v32  ;;  %v1444_v55 = vrot.slane %v1205_v24, 3 }
 0x1b9   :  { %v3792_v14 = vadd.f32 %v1440_v3, %v1128_v26  ;;  %2803 = vmatmul.msk.f32.gmra.mxu3 %vm75_vm0, %v3132_v33  ;;  %2815 = vmatmul.msk.f32.gmra.mxu0 %vm75_vm0, %v2874_v63  ;;  %v609_v33 = vrot.slane %v3492_v47, 1  ;;  %v1030_v26 = vsel %vm988_vm2, %v1028_v23, %v1029_v31  ;;  %v2878_v23 = vld [vmem:[#allocation2 + $0x50] sm:$0xff] }
 0x1ba   :  { %2831 = vmatmul.msk.f32.gmra.mxu1 %vm75_vm0, %v2874_v63  ;;  %2847 = vmatmul.msk.f32.gmra.mxu2 %vm75_vm0, %v2874_v63 }
 0x1bb   :  { %v611_v47 = vsel %vm569_vm1, %v609_v33, %v610_v4 }
 0x1bc   :  { %v863_v17 = vpop.f32.mrf.mxu3  ;;  %v715_v63 = vadd.f32 %v611_v47, %v3296_v9  ;;  %v3842_v9 = vld [vmem:[#allocation2 + $0x70] sm:$0xff]  ;;  %v619_v47 = vrot.slane %v3543_v34, 1  ;;  %v2880_v34 = vld [vmem:[#allocation2 + $0x58] sm:$0xff] }
 0x1bd   :  { %v1270_v16 = vpop.f32.mrf.mxu2  ;;  %v1046_v32 = vrot.slane %v863_v17, 2 }
 0x1be   :  { %v3800_v37 = vpop.f32.mrf.mxu0  ;;  %v1447_v24 = vrot.slane %v1270_v16, 3 }
 0x1bf   :  { %v4513_v56 = vrot.slane %v3800_v37, 2  ;;  %v1208_v28 = vpop.f32.mrf.mxu1 }
 0x1c0   :  { %v1445_v25 = vrot.slane %v1208_v28, 3 }
 0x1c1   :  { %v3809_v45 = vsel %vm988_vm2, %v1031_v11, %v4513_v56  ;;  %2804 = vmatmul.msk.f32.gmra.mxu3 %vm75_vm0, %v3811_v42  ;;  %2816 = vmatmul.msk.f32.gmra.mxu0 %vm75_vm0, %v2876_v18  ;;  %v1137_v11 = vadd.f32 %v1029_v31, %v718_v6 }
 0x1c2   :  { %v1446_v44 = vsel %vm1407_vm3, %v1444_v55, %v1445_v25  ;;  %v3819_v38 = vadd.f32 %v1445_v25, %v3531_v58  ;;  %2832 = vmatmul.msk.f32.gmra.mxu1 %vm75_vm0, %v2876_v18  ;;  %2848 = vmatmul.msk.f32.gmra.mxu2 %vm75_vm0, %v2876_v18  ;;  %v1134_v25 = vadd.f32 %v1030_v26, %v715_v63  ;;  %v4574_v63 = vld [vmem:[#allocation51_spill] sm:$0xff] }
 0x1c3   :  { %v3824_v40 = vadd.f32 %v1446_v44, %v3533_v62 }
 0x1c4   :  { %v3828_v3 = vpop.f32.mrf.mxu3 }
 0x1c5   :  { %v4514_v58 = vrot.slane %v3828_v3, 2  ;;  %v1273_v55 = vpop.f32.mrf.mxu2 }
 0x1c6   :  { %v1448_v28 = vrot.slane %v1273_v55, 3  ;;  %v922_v33 = vpop.f32.mrf.mxu0  ;;  %v618_v55 = vrot.slane %v4574_v63, 1 }
 0x1c7   :  { %v3835_v62 = vsel %vm988_vm2, %v1046_v32, %v4514_v58  ;;  %v1211_v19 = vpop.f32.mrf.mxu1  ;;  %v1040_v6 = vrot.slane %v922_v33, 2  ;;  %v4578_v58 = vld [vmem:[#allocation27_spill] sm:$0xff] }
 0x1c8   :  { %v1449_v17 = vsel %vm1407_vm3, %v1447_v24, %v1448_v28  ;;  %v3838_v16 = vadd.f32 %v1448_v28, %v1137_v11  ;;  %v1453_v44 = vrot.slane %v1211_v19, 3  ;;  %v620_v33 = vsel %vm569_vm1, %v618_v55, %v619_v47 }
 0x1c9   :  { %v3840_v4 = vadd.f32 %v1449_v17, %v1134_v25  ;;  %2805 = vmatmul.msk.f32.gmra.mxu3 %vm75_vm0, %v3842_v9  ;;  %2817 = vmatmul.msk.f32.gmra.mxu0 %vm75_vm0, %v2878_v23  ;;  %v3859_v25 = vld [vmem:[#allocation2 + $0x78] sm:$0xff]  ;;  %v721_v55 = vadd.f32 %v620_v33, %v4578_v58  ;;  %v2881_v33 = vld [vmem:[#allocation2 + $0x60] sm:$0xff] }
 0x1ca   :  { %2833 = vmatmul.msk.f32.gmra.mxu1 %vm75_vm0, %v2878_v23  ;;  %2849 = vmatmul.msk.f32.gmra.mxu2 %vm75_vm0, %v2878_v23 }
 0x1cc   :  { %v869_v31 = vpop.f32.mrf.mxu3 }
 0x1cd   :  { %v1276_v18 = vpop.f32.mrf.mxu2  ;;  %v1055_v23 = vrot.slane %v869_v31, 2  ;;  %v1140_v31 = vadd.f32 %v3787_v15, %v721_v55  ;;  %v4580_v15 = vld [vmem:[#allocation56_spill] sm:$0xff]  ;;  %v4582_v55 = vld [vmem:[#allocation54_spill] sm:$0xff] }
 0x1ce   :  { %v3850_v32 = vpop.f32.mrf.mxu0 }
 0x1cf   :  { %v4512_v26 = vrot.slane %v3850_v32, 2  ;;  %v1214_v24 = vpop.f32.mrf.mxu1 }
 0x1d0   :  { %v1454_v11 = vrot.slane %v1214_v24, 3  ;;  %v4577_v24 = vld [vmem:[#allocation29_spill] sm:$0xff] }
 0x1d1   :  { %v3857_v28 = vsel %vm988_vm2, %v1040_v6, %v4512_v26  ;;  %2806 = vmatmul.msk.f32.gmra.mxu3 %vm75_vm0, %v3859_v25  ;;  %2818 = vmatmul.msk.f32.gmra.mxu0 %vm75_vm0, %v2880_v34  ;;  %v724_v63 = vadd.f32 %v619_v47, %v4577_v24  ;;  %v1456_v26 = vrot.slane %v1276_v18, 3 }
 0x1d2   :  { %4575 = vst [vmem:[#allocation51_spill] sm:$0xff] %v3857_v28  ;;  %v1455_v19 = vsel %vm1407_vm3, %v1453_v44, %v1454_v11  ;;  %v3867_v17 = vadd.f32 %v1454_v11, %v3563_v43  ;;  %2834 = vmatmul.msk.f32.gmra.mxu1 %vm75_vm0, %v2880_v34  ;;  %2850 = vmatmul.msk.f32.gmra.mxu2 %vm75_vm0, %v2880_v34  ;;  %v4579_v43 = vrot.slane %v3780_v13, 2 }
 0x1d3   :  { %v3872_v6 = vadd.f32 %v1455_v19, %v3565_v8  ;;  %v628_v19 = vrot.slane %v4580_v15, 1  ;;  %v4585_v15 = vld [vmem:[#allocation14_spill] sm:$0xff] }
 0x1d4   :  { %4576 = vst [vmem:[#allocation61_spill] sm:$0xff] %v3867_v17  ;;  %v3875_v56 = vpop.f32.mrf.mxu3  ;;  %v1143_v11 = vadd.f32 %v4579_v43, %v724_v63  ;;  %v627_v43 = vrot.slane %v4582_v55, 1 }
 0x1d5   :  { %v4517_v44 = vrot.slane %v3875_v56, 2  ;;  %v1279_v30 = vpop.f32.mrf.mxu2 }
 0x1d6   :  { %v1457_v28 = vrot.slane %v1279_v30, 3  ;;  %v928_v17 = vpop.f32.mrf.mxu0 }
 0x1d7   :  { %v3885_v8 = vsel %vm988_vm2, %v1055_v23, %v4517_v44  ;;  %v1217_v18 = vpop.f32.mrf.mxu1 }
 0x1d8   :  { %v1458_v47 = vsel %vm1407_vm3, %v1456_v26, %v1457_v28  ;;  %v3888_v34 = vadd.f32 %v1457_v28, %v1143_v11  ;;  %v1462_v23 = vrot.slane %v1217_v18, 3  ;;  %v1049_v26 = vrot.slane %v928_v17, 2 }
 0x1d9   :  { %v3890_v58 = vadd.f32 %v1458_v47, %v1140_v31  ;;  %2819 = vmatmul.msk.f32.gmra.mxu0 %vm75_vm0, %v2881_v33  ;;  %v629_v47 = vsel %vm569_vm1, %v627_v43, %v628_v19  ;;  %v4586_v43 = vld [vmem:[#allocation31_spill] sm:$0xff] }
 0x1da   :  { %2835 = vmatmul.msk.f32.gmra.mxu1 %vm75_vm0, %v2881_v33  ;;  %2851 = vmatmul.msk.f32.gmra.mxu2 %vm75_vm0, %v2881_v33 }
 0x1dc   :  { %v3895_v13 = vpop.f32.mrf.mxu3 }
 0x1dd   :  { %v1282_v30 = vpop.f32.mrf.mxu2 }
 0x1de   :  { %v3898_v24 = vpop.f32.mrf.mxu0 }
 0x1df   :  { %4581 = vst [vmem:[#allocation29_spill] sm:$0xff] %v3898_v24  ;;  %v4516_v28 = vrot.slane %v3898_v24, 2  ;;  %v1220_v63 = vpop.f32.mrf.mxu1 }
 0x1e0   :  { %v1463_v11 = vrot.slane %v1220_v63, 3  ;;  %v1465_v63 = vrot.slane %v1282_v30, 3 }
 0x1e1   :  { %v3905_v31 = vsel %vm988_vm2, %v1049_v26, %v4516_v28  ;;  %2820 = vmatmul.msk.f32.gmra.mxu0 %vm75_vm0, %v3811_v42  ;;  %v730_v26 = vadd.f32 %v628_v19, %v4585_v15  ;;  %v727_v28 = vadd.f32 %v629_v47, %v4586_v43  ;;  %v636_v15 = vrot.slane %v3588_v51, 1 }
 0x1e2   :  { %4583 = vst [vmem:[#allocation27_spill] sm:$0xff] %v3905_v31  ;;  %v1464_v18 = vsel %vm1407_vm3, %v1462_v23, %v1463_v11  ;;  %v3912_v17 = vadd.f32 %v1463_v11, %v3595_v48  ;;  %2836 = vmatmul.msk.f32.gmra.mxu1 %vm75_vm0, %v3811_v42  ;;  %2852 = vmatmul.msk.f32.gmra.mxu2 %vm75_vm0, %v3811_v42  ;;  %v4587_v48 = vrot.slane %v3828_v3, 2 }
 0x1e3   :  { %v3919_v33 = vadd.f32 %v1464_v18, %v3597_v7  ;;  %v1146_v24 = vadd.f32 %v3835_v62, %v727_v28  ;;  %v637_v62 = vrot.slane %v3607_v57, 1 }
 0x1e4   :  { %4584 = vst [vmem:[#allocation56_spill] sm:$0xff] %v3912_v17  ;;  %v3922_v55 = vpop.f32.mrf.mxu3  ;;  %v1149_v11 = vadd.f32 %v4587_v48, %v730_v26 }
 0x1e5   :  { %v1285_v23 = vpop.f32.mrf.mxu2  ;;  %v638_v57 = vsel %vm569_vm1, %v636_v15, %v637_v62 }
 0x1e6   :  { %v1466_v44 = vrot.slane %v1285_v23, 3  ;;  %v934_v31 = vpop.f32.mrf.mxu0 }
 0x1e7   :  { %v1223_v17 = vpop.f32.mrf.mxu1 }
 0x1e8   :  { %v1467_v42 = vsel %vm1407_vm3, %v1465_v63, %v1466_v44  ;;  %v3929_v7 = vadd.f32 %v1466_v44, %v1149_v11  ;;  %v1471_v19 = vrot.slane %v1223_v17, 3  ;;  %v1058_v44 = vrot.slane %v934_v31, 2  ;;  %v4594_v17 = vld [vmem:[#allocation18_spill] sm:$0xff]  ;;  %v4595_v11 = vld [vmem:[#allocation16_spill] sm:$0xff] }
 0x1e9   :  { %v3931_v18 = vadd.f32 %v1467_v42, %v1146_v24  ;;  %2821 = vmatmul.msk.f32.gmra.mxu0 %vm75_vm0, %v3842_v9  ;;  %v736_v43 = vadd.f32 %v637_v62, %v4594_v17  ;;  %v733_v42 = vadd.f32 %v638_v57, %v4595_v11  ;;  %v1408_v62 = vrot.slane %v3629_v54, 3  ;;  %v4599_v57 = vld [vmem:[#allocation33_spill] sm:$0xff]  ;;  %v4600_v11 = vld [vmem:[#allocation34_spill] sm:$0xff] }
 0x1ea   :  { %4588 = vst [vmem:[#allocation54_spill] sm:$0xff] %v3929_v7  ;;  %2837 = vmatmul.msk.f32.gmra.mxu1 %vm75_vm0, %v3842_v9  ;;  %2853 = vmatmul.msk.f32.gmra.mxu2 %vm75_vm0, %v3842_v9  ;;  %v576_v17 = vrot.slane %v4599_v57, 1  ;;  %v995_v54 = vrot.slane %v3623_v2, 2 }
 0x1eb   :  { %4589 = vst [vmem:[#allocation14_spill] sm:$0xff] %v3931_v18 }
 0x1ec   :  { %v3939_v3 = vpop.f32.mrf.mxu3 }
 0x1ed   :  { %v1288_v30 = vpop.f32.mrf.mxu2 }
 0x1ee   :  { %v3942_v28 = vpop.f32.mrf.mxu0  ;;  %v1474_v23 = vrot.slane %v1288_v30, 3  ;;  %v1409_v30 = vrot.slane %v3647_v21, 3  ;;  %v4601_v21 = vld [vmem:[#allocation36_spill] sm:$0xff] }
 0x1ef   :  { %4590 = vst [vmem:[#allocation31_spill] sm:$0xff] %v3942_v28  ;;  %v4519_v24 = vrot.slane %v3942_v28, 2  ;;  %v1226_v47 = vpop.f32.mrf.mxu1 }
 0x1f0   :  { %v1472_v26 = vrot.slane %v1226_v47, 3 }
 0x1f1   :  { %v3949_v63 = vsel %vm988_vm2, %v1058_v44, %v4519_v24  ;;  %2822 = vmatmul.msk.f32.gmra.mxu0 %vm75_vm0, %v3859_v25 }
 0x1f2   :  { %4591 = vst [vmem:[#allocation62_spill] sm:$0xff] %v3949_v63  ;;  %v1473_v9 = vsel %vm1407_vm3, %v1471_v19, %v1472_v26  ;;  %v3956_v31 = vadd.f32 %v1472_v26, %v3632_v36  ;;  %2838 = vmatmul.msk.f32.gmra.mxu1 %vm75_vm0, %v3859_v25  ;;  %2854 = vmatmul.msk.f32.gmra.mxu2 %vm75_vm0, %v3859_v25  ;;  %v4596_v36 = vrot.slane %v3875_v56, 2  ;;  %v577_v56 = vrot.slane %v4600_v11, 1  ;;  %v4602_v11 = vld [vmem:[#allocation37_spill] sm:$0xff] }
 0x1f3   :  { %v3963_v51 = vadd.f32 %v1473_v9, %v3634_v0  ;;  %v1152_v26 = vadd.f32 %v3885_v8, %v733_v42  ;;  %v996_v42 = vrot.slane %v3645_v50, 2  ;;  %v4603_v50 = vld [vmem:[#allocation12_spill] sm:$0xff] }
 0x1f4   :  { %4592 = vst [vmem:[#allocation63_spill] sm:$0xff] %v3956_v31  ;;  %v3966_v48 = vpop.f32.mrf.mxu3  ;;  %v1155_v44 = vadd.f32 %v4596_v36, %v736_v43  ;;  %v1410_v43 = vsel %vm1407_vm3, %v1408_v62, %v1409_v30  ;;  %v578_v8 = vsel %vm569_vm1, %v576_v17, %v577_v56  ;;  %v1414_v62 = vrot.slane %v3895_v13, 3  ;;  %v4620_v31 = vld [vmem:[#allocation44_spill] sm:$0xff] }
 0x1f5   :  { %4593 = vst [vmem:[#allocation64_spill] sm:$0xff] %v3963_v51  ;;  %v1291_v19 = vpop.f32.mrf.mxu2  ;;  %v1528_v63 = vadd.f32 %v1410_v43, %v4602_v11  ;;  %v1415_v17 = vrot.slane %v3922_v55, 3  ;;  %v997_v51 = vsel %vm988_vm2, %v995_v54, %v996_v42 }
 0x1f6   :  { %v1475_v47 = vrot.slane %v1291_v19, 3  ;;  %v1600_v15 = vpop.f32.mrf.mxu0 }
 0x1f7   :  { %v1665_v24 = vpop.f32.mrf.mxu1 }
 0x1f8   :  { %v1476_v25 = vsel %vm1407_vm3, %v1474_v23, %v1475_v47  ;;  %v3973_v0 = vadd.f32 %v1475_v47, %v1155_v44  ;;  %v1830_v23 = vrot.slane %v1665_v24, 4  ;;  %v1531_v47 = vadd.f32 %v1409_v30, %v4601_v21 }
 0x1f9   :  { %v3977_v9 = vadd.f32 %v1476_v25, %v1152_v26  ;;  %v1827_v26 = vrot.slane %v1600_v15, 4  ;;  %v695_v24 = vadd.f32 %v577_v56, %v4603_v50 }
 0x1fa   :  { %4597 = vst [vmem:[#allocation18_spill] sm:$0xff] %v3973_v0 }
 0x1fb   :  { %4598 = vst [vmem:[#allocation16_spill] sm:$0xff] %v3977_v9  ;;  %v1114_v43 = vadd.f32 %v996_v42, %v695_v24 }
 0x1fc   :  { %v3984_v36 = vpop.f32.mrf.mxu3 }
 0x1fd   :  { %v1730_v19 = vpop.f32.mrf.mxu2 }
 0x1fe   :  { %v1603_v44 = vpop.f32.mrf.mxu0  ;;  %v1833_v56 = vrot.slane %v1730_v19, 4 }
 0x1ff   :  { %v1828_v25 = vrot.slane %v1603_v44, 4  ;;  %v1668_v57 = vpop.f32.mrf.mxu1  ;;  %v4604_v44 = vld [vmem:[#allocation11_spill] sm:$0xff] }
 0x200   :  { %v1831_v9 = vrot.slane %v1668_v57, 4  ;;  %v692_v21 = vadd.f32 %v578_v8, %v4604_v44  ;;  %v1416_v57 = vsel %vm1407_vm3, %v1414_v62, %v1415_v17 }
 0x201   :  { %v1829_v28 = vsel %vm1826_vm4, %v1827_v26, %v1828_v25  ;;  %v1950_v0 = vadd.f32 %v1828_v25, %v1531_v47 }
 0x202   :  { %v1947_v2 = vadd.f32 %v1829_v28, %v1528_v63  ;;  %v1832_v30 = vsel %vm1826_vm4, %v1830_v23, %v1831_v9  ;;  %v1951_v15 = vadd.f32 %v1831_v9, %v3672_v46  ;;  %v1111_v26 = vadd.f32 %v997_v51, %v692_v21 }
 0x203   :  { %v1995_v13 = vsel %vm1826_vm4, %v1950_v0, -inf  ;;  %v1948_v55 = vadd.f32 %v1832_v30, %v3674_v35  ;;  %v1533_v63 = vadd.f32 %v1415_v17, %v1114_v43  ;;  %v1417_v9 = vrot.slane %v3669_v41, 3 }
 0x204   :  { %v1996_v11 = vmax.f32 %v1947_v2, %v1995_v13  ;;  %v2003_v47 = vsel %vm1826_vm4, %v1951_v15, -inf  ;;  %v1530_v8 = vadd.f32 %v1416_v57, %v1111_v26  ;;  %v1418_v35 = vrot.slane %v3687_v1, 3  ;;  %v4003_v62 = vpop.f32.mrf.mxu3 }
 0x205   :  { %v2004_v54 = vmax.f32 %v1948_v55, %v2003_v47  ;;  %v1733_v28 = vpop.f32.mrf.mxu2 }
 0x206   :  { %v1997_v23 = vrot.slane %v1996_v11, 4  ;;  %v1834_v25 = vrot.slane %v1733_v28, 4  ;;  %v1606_v46 = vpop.f32.mrf.mxu0  ;;  %v1419_v44 = vsel %vm1407_vm3, %v1417_v9, %v1418_v35 }
 0x207   :  { %v2005_v42 = vrot.slane %v2004_v54, 4  ;;  %v1671_v0 = vpop.f32.mrf.mxu1 }
 0x208   :  { %v1998_v50 = vmax.f32 %v1996_v11, %v1997_v23  ;;  %v1835_v19 = vsel %vm1826_vm4, %v1833_v56, %v1834_v25  ;;  %v1952_v24 = vadd.f32 %v1834_v25, %v1533_v63  ;;  %v1839_v1 = vrot.slane %v1671_v0, 4  ;;  %v4605_v11 = vld [vmem:[#allocation41_spill] sm:$0xff]  ;;  %v4606_v56 = vld [vmem:[#allocation40_spill] sm:$0xff]  ;;  %v4609_v0 = vld [vmem:[#allocation38_spill] sm:$0xff] }
 0x209   :  { %v2006_v51 = vmax.f32 %v2004_v54, %v2005_v42  ;;  %v1949_v2 = vadd.f32 %v1835_v19, %v1530_v8  ;;  %v1534_v47 = vadd.f32 %v1419_v44, %v4605_v11  ;;  %v1537_v26 = vadd.f32 %v1418_v35, %v4606_v56  ;;  %v4608_v42 = vld [vmem:[#allocation35_spill] sm:$0xff]  ;;  %v4611_v44 = vld [vmem:[#allocation42_spill] sm:$0xff] }
 0x20a   :  { %v1999_v30 = vrot.slane %v1998_v50, 2  ;;  %v2011_v17 = vsel %vm1826_vm4, %v1952_v24, -inf  ;;  %v1836_v54 = vrot.slane %v1606_v46, 4 }
 0x20b   :  { %v2012_v15 = vmax.f32 %v1949_v2, %v2011_v17  ;;  %v2007_v41 = vrot.slane %v2006_v51, 2  ;;  %v586_v2 = vrot.slane %v4609_v0, 1 }
 0x20c   :  { %v2000_v21 = vmax.f32 %v1998_v50, %v1999_v30  ;;  %v585_v50 = vrot.slane %v4608_v42, 1  ;;  %v4017_v30 = vpop.f32.mrf.mxu3  ;;  %v1427_v42 = vrot.slane %v3729_v12, 3  ;;  %v4617_v12 = vld [vmem:[#allocation43_spill] sm:$0xff] }
 0x20d   :  { %v2013_v43 = vrot.slane %v2012_v15, 4  ;;  %v4008_v13 = vpop.f32.mrf.mxu2  ;;  %v2008_v9 = vmax.f32 %v2006_v51, %v2007_v41  ;;  %v4610_v51 = vld [vmem:[#allocation39_spill] sm:$0xff]  ;;  %v595_v41 = vrot.slane %v4611_v44, 1 }
 0x20e   :  { %v1609_v55 = vpop.f32.mrf.mxu0  ;;  %v2001_v57 = vrot.slane %v2000_v21, 1  ;;  %v4614_v44 = vld [vmem:[#allocation15_spill] sm:$0xff]  ;;  %v1543_v18 = vadd.f32 %v1427_v42, %v4620_v31 }
 0x20f   :  { %v1837_v28 = vrot.slane %v1609_v55, 4  ;;  %v1674_v63 = vpop.f32.mrf.mxu1  ;;  %v2014_v23 = vmax.f32 %v2012_v15, %v2013_v43  ;;  %v594_v15 = vrot.slane %v4610_v51, 1 }
 0x210   :  { %v1840_v25 = vrot.slane %v1674_v63, 4  ;;  %v4012_v8 = vmax.f32 %v2000_v21, %v2001_v57  ;;  %v2009_v57 = vrot.slane %v2008_v9, 1  ;;  %v1426_v63 = vrot.slane %v3709_v61, 3 }
 0x211   :  { %v1838_v19 = vsel %vm1826_vm4, %v1836_v54, %v1837_v28  ;;  %v1956_v24 = vadd.f32 %v1837_v28, %v1537_v26  ;;  %v587_v54 = vsel %vm569_vm1, %v585_v50, %v586_v2  ;;  %v596_v28 = vsel %vm569_vm1, %v594_v15, %v595_v41  ;;  %v4615_v50 = vld [vmem:[#allocation19_spill] sm:$0xff] }
 0x212   :  { %4607 = vst [vmem:[#allocation33_spill] sm:$0xff] %v4012_v8  ;;  %v1953_v17 = vadd.f32 %v1838_v19, %v1534_v47  ;;  %v1841_v35 = vsel %vm1826_vm4, %v1839_v1, %v1840_v25  ;;  %v1957_v46 = vadd.f32 %v1840_v25, %v3712_v60  ;;  %2259 = vrot.lane.b32.xlu1 %v4012_v8, %s2966_s0  ;;  %v2015_v60 = vrot.slane %v2014_v23, 2 }
 0x213   :  { %2227 = vrot.lane.b32.xlu2 %v4012_v8, %s2967_s1  ;;  %v2019_v21 = vsel %vm1826_vm4, %v1956_v24, -inf  ;;  %v1954_v43 = vadd.f32 %v1841_v35, %v3714_v10  ;;  %2195 = vrot.lane.b32.xlu0 %v4012_v8, %s2968_s7  ;;  %v1005_v10 = vrot.slane %v3685_v53, 2  ;;  %v4039_v24 = vmax.f32 %v2008_v9, %v2009_v57  ;;  %v4616_v53 = vld [vmem:[#allocation17_spill] sm:$0xff]  ;;  %v4618_v9 = vld [vmem:[#allocation46_spill] sm:$0xff] }
 0x214   :  { %v2020_v1 = vmax.f32 %v1953_v17, %v2019_v21  ;;  %v2027_v55 = vsel %vm1826_vm4, %v1957_v46, -inf  ;;  %v2016_v0 = vmax.f32 %v2014_v23, %v2015_v60  ;;  %v4612_v17 = vld [vmem:[#allocation60_spill] sm:$0xff]  ;;  %v4613_v46 = vld [vmem:[#allocation13_spill] sm:$0xff]  ;;  %v701_v21 = vadd.f32 %v586_v2, %v4614_v44 }
 0x215   :  { %v2028_v11 = vmax.f32 %v1954_v43, %v2027_v55  ;;  %v4032_v47 = vpop.f32.mrf.mxu2  ;;  %v1004_v35 = vrot.slane %v4612_v17, 2  ;;  %v698_v51 = vadd.f32 %v587_v54, %v4613_v46  ;;  %v707_v43 = vadd.f32 %v595_v41, %v4615_v50  ;;  %v4056_v41 = vpop.f32.mrf.mxu3 }
 0x216   :  { %v2021_v56 = vrot.slane %v2020_v1, 4  ;;  %v1612_v26 = vpop.f32.mrf.mxu0  ;;  %v4050_v61 = vadd.f32 %v596_v28, %v4616_v53  ;;  %v1428_v2 = vsel %vm1407_vm3, %v1426_v63, %v1427_v42  ;;  %v2017_v57 = vrot.slane %v2016_v0, 1  ;;  %v4619_v63 = vld [vmem:[#allocation45_spill] sm:$0xff] }
 0x217   :  { %v1677_v25 = vpop.f32.mrf.mxu1  ;;  %v2029_v55 = vrot.slane %v2028_v11, 4  ;;  %v1120_v54 = vadd.f32 %v1005_v10, %v701_v21  ;;  %v1014_v17 = vrot.slane %v3727_v20, 2  ;;  %v1423_v46 = vrot.slane %v3939_v3, 3 }
 0x218   :  { %v2022_v19 = vmax.f32 %v2020_v1, %v2021_v56  ;;  %v1006_v1 = vsel %vm988_vm2, %v1004_v35, %v1005_v10  ;;  %v1424_v28 = vrot.slane %v3966_v48, 3  ;;  %v1013_v53 = vrot.slane %v3706_v52, 2 }
 0x219   :  { %v1117_v50 = vadd.f32 %v1006_v1, %v698_v51  ;;  %v1848_v23 = vrot.slane %v1677_v25, 4  ;;  %v1540_v8 = vadd.f32 %v1428_v2, %v4619_v63  ;;  %v1845_v7 = vrot.slane %v1612_v26, 4 }
 0x21a   :  { %v2023_v15 = vrot.slane %v2022_v19, 2  ;;  %2371 = vrot.lane.b32.xlu1 %v4039_v24, %s2966_s0  ;;  %v2030_v21 = vmax.f32 %v2028_v11, %v2029_v55  ;;  %v1015_v48 = vsel %vm988_vm2, %v1013_v53, %v1014_v17  ;;  %v1425_v52 = vsel %vm1407_vm3, %v1423_v46, %v1424_v28 }
 0x21b   :  { %2307 = vrot.lane.b32.xlu2 %v4039_v24, %s2968_s7  ;;  %v1432_v1 = vrot.slane %v3984_v36, 3  ;;  %v1842_v11 = vrot.slane %v4008_v13, 4  ;;  %v1843_v42 = vrot.slane %v4032_v47, 4  ;;  %v1433_v36 = vrot.slane %v4003_v62, 3 }
 0x21c   :  { %v2024_v56 = vmax.f32 %v2022_v19, %v2023_v15  ;;  %v4064_v15 = vmax.f32 %v2016_v0, %v2017_v57  ;;  %v1539_v55 = vadd.f32 %v1424_v28, %v1120_v54  ;;  %v1436_v47 = vrot.slane %v3767_v29, 3 }
 0x21d   :  { %v1742_v44 = vpop.f32.mrf.mxu2  ;;  %v1536_v63 = vadd.f32 %v1425_v52, %v1117_v50  ;;  %v1844_v62 = vsel %vm1826_vm4, %v1842_v11, %v1843_v42  ;;  %v1123_v28 = vadd.f32 %v1015_v48, %v4050_v61  ;;  %v1023_v29 = vrot.slane %v3765_v49, 2 }
 0x21e   :  { %v1615_v35 = vpop.f32.mrf.mxu0  ;;  %v2025_v60 = vrot.slane %v2024_v56, 1  ;;  %v4621_v52 = vrot.slane %v4618_v9, 1  ;;  %v1022_v49 = vrot.slane %v3747_v27, 2  ;;  %v4626_v9 = vld [vmem:[#allocation48_spill] sm:$0xff] }
 0x21f   :  { %v1846_v19 = vrot.slane %v1615_v35, 4  ;;  %v1680_v10 = vpop.f32.mrf.mxu1 }
 0x220   :  { %v1849_v20 = vrot.slane %v1680_v10, 4  ;;  %v4066_v3 = vmax.f32 %v2024_v56, %v2025_v60  ;;  %v1435_v60 = vrot.slane %v3749_v39, 3  ;;  %v4088_v56 = vpop.f32.mrf.mxu3 }
 0x221   :  { %v1847_v25 = vsel %vm1826_vm4, %v1845_v7, %v1846_v19  ;;  %v1962_v51 = vadd.f32 %v1846_v19, %v1543_v18  ;;  %v1958_v19 = vadd.f32 %v1843_v42, %v1539_v55 }
 0x222   :  { %v1959_v2 = vadd.f32 %v1847_v25, %v1540_v8  ;;  %v1850_v31 = vsel %vm1826_vm4, %v1848_v23, %v1849_v20  ;;  %v1963_v26 = vadd.f32 %v1849_v20, %v3752_v22  ;;  %2483 = vrot.lane.b32.xlu1 %v4064_v15, %s2966_s0  ;;  %2197 = vrot.lane.b32.xlu0 %v4066_v3, %s2968_s7  ;;  %v2031_v22 = vrot.slane %v2030_v21, 2 }
 0x223   :  { %2339 = vrot.lane.b32.xlu2 %v4039_v24, %s2967_s1  ;;  %v2043_v7 = vsel %vm1826_vm4, %v1962_v51, -inf  ;;  %v1960_v18 = vadd.f32 %v1850_v31, %v3754_v59  ;;  %v1126_v23 = vadd.f32 %v1014_v17, %v707_v43  ;;  %v1851_v59 = vrot.slane %v1742_v44, 4  ;;  %v4623_v31 = vld [vmem:[#allocation23_spill] sm:$0xff] }
 0x224   :  { %v2044_v8 = vmax.f32 %v1959_v2, %v2043_v7  ;;  %v2051_v0 = vsel %vm1826_vm4, %v1963_v26, -inf  ;;  %v1434_v43 = vsel %vm1407_vm3, %v1432_v1, %v1433_v36  ;;  %v2032_v17 = vmax.f32 %v2030_v21, %v2031_v22 }
 0x225   :  { %v2052_v13 = vmax.f32 %v1960_v18, %v2051_v0  ;;  %v1745_v57 = vpop.f32.mrf.mxu2  ;;  %v1545_v39 = vadd.f32 %v1433_v36, %v1126_v23  ;;  %v1955_v44 = vadd.f32 %v1844_v62, %v1536_v63  ;;  %v4622_v21 = vrot.slane %v4617_v12, 1 }
 0x226   :  { %v2045_v46 = vrot.slane %v2044_v8, 4  ;;  %v1852_v53 = vrot.slane %v1745_v57, 4  ;;  %v1618_v35 = vpop.f32.mrf.mxu0  ;;  %v1542_v48 = vadd.f32 %v1434_v43, %v1123_v28  ;;  %v2035_v1 = vsel %vm1826_vm4, %v1958_v19, -inf }
 0x227   :  { %v2053_v10 = vrot.slane %v2052_v13, 4  ;;  %v1683_v20 = vpop.f32.mrf.mxu1  ;;  %v605_v61 = vsel %vm569_vm1, %v4622_v21, %v4621_v52  ;;  %v4624_v26 = vmov %v4621_v52  ;;  %v1437_v42 = vsel %vm1407_vm3, %v1435_v60, %v1436_v47 }
 0x228   :  { %v2046_v54 = vmax.f32 %v2044_v8, %v2045_v46  ;;  %v1853_v2 = vsel %vm1826_vm4, %v1851_v59, %v1852_v53  ;;  %v1964_v50 = vadd.f32 %v1852_v53, %v1545_v39  ;;  %v713_v11 = vadd.f32 %v4624_v26, %v4623_v31  ;;  %v4625_v59 = vld [vmem:[#allocation49_spill] sm:$0xff] }
 0x229   :  { %v2054_v25 = vmax.f32 %v2052_v13, %v2053_v10  ;;  %v2033_v7 = vrot.slane %v2032_v17, 1  ;;  %v1024_v36 = vsel %vm988_vm2, %v1022_v49, %v1023_v29  ;;  %v1961_v8 = vadd.f32 %v1853_v2, %v1542_v48  ;;  %v4116_v10 = vpop.f32.mrf.mxu3 }
 0x22a   :  { %v2047_v51 = vrot.slane %v2046_v54, 2  ;;  %2261 = vrot.lane.b32.xlu1 %v4066_v3, %s2966_s0  ;;  %v1854_v12 = vrot.slane %v1618_v35, 4  ;;  %v2036_v23 = vmax.f32 %v1955_v44, %v2035_v1  ;;  %v2059_v27 = vsel %vm1826_vm4, %v1964_v50, -inf }
 0x22b   :  { %2419 = vrot.lane.b32.xlu2 %v4064_v15, %s2968_s7  ;;  %v2055_v22 = vrot.slane %v2054_v25, 2  ;;  %v1857_v55 = vrot.slane %v1683_v20, 4  ;;  %v1546_v46 = vadd.f32 %v1437_v42, %v4625_v59  ;;  %v1549_v53 = vadd.f32 %v1436_v47, %v4626_v9 }
 0x22c   :  { %v2048_v18 = vmax.f32 %v2046_v54, %v2047_v51  ;;  %v1441_v60 = vrot.slane %v4017_v30, 3  ;;  %v1442_v19 = vrot.slane %v4056_v41, 3  ;;  %v4118_v43 = vmax.f32 %v2032_v17, %v2033_v7  ;;  %v4627_v41 = vld [vmem:[#allocation21_spill] sm:$0xff] }
 0x22d   :  { %v1748_v0 = vpop.f32.mrf.mxu2  ;;  %v2060_v20 = vmax.f32 %v1961_v8, %v2059_v27  ;;  %v2056_v44 = vmax.f32 %v2054_v25, %v2055_v22  ;;  %v2037_v51 = vrot.slane %v2036_v23, 4  ;;  %v710_v17 = vadd.f32 %v605_v61, %v4627_v41 }
 0x22e   :  { %v1621_v13 = vpop.f32.mrf.mxu0  ;;  %v2049_v57 = vrot.slane %v2048_v18, 1  ;;  %v1132_v50 = vadd.f32 %v1023_v29, %v713_v11  ;;  %v1443_v25 = vsel %vm1407_vm3, %v1441_v60, %v1442_v19  ;;  %v1860_v49 = vrot.slane %v1748_v0, 4 }
 0x22f   :  { %v1855_v63 = vrot.slane %v1621_v13, 4  ;;  %v1686_v62 = vpop.f32.mrf.mxu1  ;;  %v1129_v1 = vadd.f32 %v1024_v36, %v710_v17  ;;  %v2061_v31 = vrot.slane %v2060_v20, 4  ;;  %v2057_v7 = vrot.slane %v2056_v44, 1  ;;  %v4629_v13 = vld [vmem:[#allocation50_spill] sm:$0xff] }
 0x230   :  { %v1858_v35 = vrot.slane %v1686_v62, 4  ;;  %v4120_v39 = vmax.f32 %v2048_v18, %v2049_v57  ;;  %v1551_v61 = vadd.f32 %v1442_v19, %v1132_v50  ;;  %v2038_v29 = vmax.f32 %v2036_v23, %v2037_v51 }
 0x231   :  { %v1856_v54 = vsel %vm1826_vm4, %v1854_v12, %v1855_v63  ;;  %v1968_v28 = vadd.f32 %v1855_v63, %v1549_v53  ;;  %v1548_v12 = vadd.f32 %v1443_v25, %v1129_v1  ;;  %v613_v0 = vrot.slane %v4629_v13, 1  ;;  %v4141_v63 = vpop.f32.mrf.mxu3 }
 0x232   :  { %v1965_v47 = vadd.f32 %v1856_v54, %v1546_v46  ;;  %v1859_v30 = vsel %vm1826_vm4, %v1857_v55, %v1858_v35  ;;  %v1969_v2 = vadd.f32 %v1858_v35, %v3790_v5  ;;  %2309 = vrot.lane.b32.xlu1 %v4118_v43, %s2968_s7  ;;  %2231 = vrot.lane.b32.xlu0 %v4120_v39, %s2967_s1  ;;  %v2039_v23 = vrot.slane %v2038_v29, 2 }
 0x233   :  { %2451 = vrot.lane.b32.xlu2 %v4064_v15, %s2967_s1  ;;  %v2067_v52 = vsel %vm1826_vm4, %v1968_v28, -inf  ;;  %v1966_v21 = vadd.f32 %v1859_v30, %v3792_v14  ;;  %v4628_v14 = vld [vmem:[#allocation47_spill] sm:$0xff]  ;;  %v2062_v46 = vmax.f32 %v2060_v20, %v2061_v31  ;;  %v4139_v60 = vmax.f32 %v2056_v44, %v2057_v7  ;;  %v4631_v31 = vld [vmem:[#allocation25_spill] sm:$0xff] }
 0x234   :  { %v2068_v5 = vmax.f32 %v1965_v47, %v2067_v52  ;;  %v2075_v48 = vsel %vm1826_vm4, %v1969_v2, -inf  ;;  %v612_v8 = vrot.slane %v4628_v14, 1  ;;  %v4630_v2 = vld [vmem:[#allocation26_spill] sm:$0xff]  ;;  %v1450_v25 = vrot.slane %v4088_v56, 3 }
 0x235   :  { %v2076_v26 = vmax.f32 %v1966_v21, %v2075_v48  ;;  %v1751_v42 = vpop.f32.mrf.mxu2  ;;  %v2063_v44 = vrot.slane %v2062_v46, 2  ;;  %v719_v41 = vadd.f32 %v613_v0, %v4630_v2  ;;  %v2040_v21 = vmax.f32 %v2038_v29, %v2039_v23  ;;  %v4634_v2 = vld [vmem:[#allocation53_spill] sm:$0xff] }
 0x236   :  { %v2069_v11 = vrot.slane %v2068_v5, 4  ;;  %v1861_v18 = vrot.slane %v1751_v42, 4  ;;  %v1624_v22 = vpop.f32.mrf.mxu0  ;;  %v614_v28 = vsel %vm569_vm1, %v612_v8, %v613_v0 }
 0x237   :  { %v2077_v27 = vrot.slane %v2076_v26, 4  ;;  %v1689_v55 = vpop.f32.mrf.mxu1  ;;  %v1863_v47 = vrot.slane %v1624_v22, 4  ;;  %v2064_v14 = vmax.f32 %v2062_v46, %v2063_v44 }
 0x238   :  { %v2070_v57 = vmax.f32 %v2068_v5, %v2069_v11  ;;  %v1862_v59 = vsel %vm1826_vm4, %v1860_v49, %v1861_v18  ;;  %v1970_v36 = vadd.f32 %v1861_v18, %v1551_v61  ;;  %v1866_v17 = vrot.slane %v1689_v55, 4 }
 0x239   :  { %v2078_v9 = vmax.f32 %v2076_v26, %v2077_v27  ;;  %v1967_v53 = vadd.f32 %v1862_v59, %v1548_v12  ;;  %v1451_v49 = vrot.slane %v4116_v10, 3  ;;  %v716_v26 = vadd.f32 %v614_v28, %v4631_v31  ;;  %v4173_v55 = vpop.f32.mrf.mxu3 }
 0x23a   :  { %v2071_v62 = vrot.slane %v2070_v57, 2  ;;  %v2083_v19 = vsel %vm1826_vm4, %v1970_v36, -inf  ;;  %2341 = vrot.lane.b32.xlu1 %v4118_v43, %s2967_s1  ;;  %2311 = vrot.lane.b32.xlu0 %v4139_v60, %s2968_s7  ;;  %v4632_v11 = vrot.slane %v3800_v37, 2  ;;  %v2041_v12 = vrot.slane %v2040_v21, 1 }
 0x23b   :  { %2229 = vrot.lane.b32.xlu2 %v4066_v3, %s2967_s1  ;;  %v2079_v35 = vrot.slane %v2078_v9, 2  ;;  %v2084_v54 = vmax.f32 %v1967_v53, %v2083_v19  ;;  %v1452_v37 = vsel %vm1407_vm3, %v1450_v25, %v1451_v49  ;;  %v1135_v59 = vadd.f32 %v3809_v45, %v716_v26 }
 0x23c   :  { %v2072_v20 = vmax.f32 %v2070_v57, %v2071_v62  ;;  %v1138_v18 = vadd.f32 %v4632_v11, %v719_v41  ;;  %v622_v41 = vrot.slane %v4634_v2, 1  ;;  %v1460_v31 = vrot.slane %v4173_v55, 3 }
 0x23d   :  { %v2085_v51 = vrot.slane %v2084_v54, 4  ;;  %v1754_v30 = vpop.f32.mrf.mxu2  ;;  %v2080_v1 = vmax.f32 %v2078_v9, %v2079_v35  ;;  %v2065_v9 = vrot.slane %v2064_v14, 1  ;;  %v1554_v19 = vadd.f32 %v1452_v37, %v1135_v59 }
 0x23e   :  { %v1627_v50 = vpop.f32.mrf.mxu0  ;;  %v2073_v52 = vrot.slane %v2072_v20, 1  ;;  %v1869_v13 = vrot.slane %v1754_v30, 4  ;;  %v1557_v53 = vadd.f32 %v1451_v49, %v1138_v18  ;;  %v4633_v30 = vld [vmem:[#allocation52_spill] sm:$0xff] }
 0x23f   :  { %v1864_v5 = vrot.slane %v1627_v50, 4  ;;  %v1692_v48 = vpop.f32.mrf.mxu1  ;;  %v2086_v42 = vmax.f32 %v2084_v54, %v2085_v51  ;;  %v4177_v54 = vmax.f32 %v2040_v21, %v2041_v12  ;;  %v621_v45 = vrot.slane %v4633_v30, 1 }
 0x240   :  { %v1867_v7 = vrot.slane %v1692_v48, 4  ;;  %v4155_v61 = vmax.f32 %v2072_v20, %v2073_v52  ;;  %v4184_v50 = vmax.f32 %v2064_v14, %v2065_v9 }
 0x241   :  { %v1865_v22 = vsel %vm1826_vm4, %v1863_v47, %v1864_v5  ;;  %v1974_v29 = vadd.f32 %v1864_v5, %v3819_v38  ;;  %v623_v48 = vsel %vm569_vm1, %v621_v45, %v622_v41 }
 0x242   :  { %v1971_v56 = vadd.f32 %v1865_v22, %v3824_v40  ;;  %v1868_v10 = vsel %vm1826_vm4, %v1866_v17, %v1867_v7  ;;  %v1975_v8 = vadd.f32 %v1867_v7, %v3838_v16  ;;  %2373 = vrot.lane.b32.xlu1 %v4118_v43, %s2966_s0  ;;  %2343 = vrot.lane.b32.xlu0 %v4139_v60, %s2967_s1  ;;  %v2081_v40 = vrot.slane %v2080_v1, 1  ;;  %v4196_v7 = vpop.f32.mrf.mxu3  ;;  %v4635_v22 = vld [vmem:[#allocation30_spill] sm:$0xff] }
 0x243   :  { %2265 = vrot.lane.b32.xlu2 %v4155_v61, %s2966_s0  ;;  %v2091_v27 = vsel %vm1826_vm4, %v1974_v29, -inf  ;;  %v1972_v38 = vadd.f32 %v1868_v10, %v3840_v4  ;;  %v2087_v16 = vrot.slane %v2086_v42, 2  ;;  %v725_v29 = vadd.f32 %v622_v41, %v4635_v22 }
 0x244   :  { %v2092_v0 = vmax.f32 %v1971_v56, %v2091_v27  ;;  %v2099_v57 = vsel %vm1826_vm4, %v1975_v8, -inf  ;;  %v4179_v20 = vmax.f32 %v2080_v1, %v2081_v40  ;;  %v1459_v1 = vrot.slane %v4141_v63, 3  ;;  %v4636_v8 = vld [vmem:[#allocation28_spill] sm:$0xff] }
 0x245   :  { %v2100_v36 = vmax.f32 %v1972_v38, %v2099_v57  ;;  %v1757_v46 = vpop.f32.mrf.mxu2  ;;  %v2088_v47 = vmax.f32 %v2086_v42, %v2087_v16  ;;  %v722_v12 = vadd.f32 %v623_v48, %v4636_v8  ;;  %v4637_v63 = vrot.slane %v3850_v32, 2 }
 0x246   :  { %v2093_v23 = vrot.slane %v2092_v0, 4  ;;  %v1870_v62 = vrot.slane %v1757_v46, 4  ;;  %v1630_v4 = vpop.f32.mrf.mxu0  ;;  %v1461_v55 = vsel %vm1407_vm3, %v1459_v1, %v1460_v31  ;;  %v4641_v1 = vld [vmem:[#allocation57_spill] sm:$0xff] }
 0x247   :  { %v1695_v35 = vpop.f32.mrf.mxu1  ;;  %v2101_v21 = vrot.slane %v2100_v36, 4  ;;  %v2089_v5 = vrot.slane %v2088_v47, 1  ;;  %v1872_v26 = vrot.slane %v1630_v4, 4  ;;  %v1144_v40 = vadd.f32 %v4637_v63, %v725_v29  ;;  %v4639_v4 = vld [vmem:[#allocation51_spill] sm:$0xff] }
 0x248   :  { %v2094_v28 = vmax.f32 %v2092_v0, %v2093_v23  ;;  %v1871_v44 = vsel %vm1826_vm4, %v1869_v13, %v1870_v62  ;;  %v1976_v51 = vadd.f32 %v1870_v62, %v1557_v53  ;;  %v1875_v11 = vrot.slane %v1695_v35, 4  ;;  %v4638_v13 = vld [vmem:[#allocation61_spill] sm:$0xff] }
 0x249   :  { %v1973_v17 = vadd.f32 %v1871_v44, %v1554_v19  ;;  %v2102_v14 = vmax.f32 %v2100_v36, %v2101_v21  ;;  %v4200_v27 = vmax.f32 %v2088_v47, %v2089_v5  ;;  %v1141_v19 = vadd.f32 %v4639_v4, %v722_v12  ;;  %v4640_v5 = vld [vmem:[#allocation55_spill] sm:$0xff] }
 0x24a   :  { %v2107_v52 = vsel %vm1826_vm4, %v1976_v51, -inf  ;;  %2421 = vrot.lane.b32.xlu1 %v4177_v54, %s2968_s7  ;;  %2423 = vrot.lane.b32.xlu0 %v4184_v50, %s2968_s7  ;;  %v2095_v49 = vrot.slane %v2094_v28, 2  ;;  %v1563_v44 = vadd.f32 %v1460_v31, %v1144_v40  ;;  %v1350_v2 = vpop.f32.mrf.mxu3  ;;  %v630_v48 = vrot.slane %v4640_v5, 1 }
 0x24b   :  { %2377 = vrot.lane.b32.xlu2 %v4179_v20, %s2966_s0  ;;  %v2108_v25 = vmax.f32 %v1973_v17, %v2107_v52  ;;  %v2103_v32 = vrot.slane %v2102_v14, 2  ;;  %v1560_v30 = vadd.f32 %v1461_v55, %v1141_v19  ;;  %v1469_v8 = vrot.slane %v1350_v2, 3  ;;  %v4642_v55 = vld [vmem:[#allocation32_spill] sm:$0xff] }
 0x24c   :  { %v2096_v38 = vmax.f32 %v2094_v28, %v2095_v49 }
 0x24d   :  { %v1760_v42 = vpop.f32.mrf.mxu2  ;;  %v2109_v46 = vrot.slane %v2108_v25, 4 }
 0x24e   :  { %v1633_v18 = vpop.f32.mrf.mxu0  ;;  %v2097_v62 = vrot.slane %v2096_v38, 1 }
 0x24f   :  { %v1873_v56 = vrot.slane %v1633_v18, 4  ;;  %v1698_v10 = vpop.f32.mrf.mxu1  ;;  %v2110_v41 = vmax.f32 %v2108_v25, %v2109_v46 }
 0x250   :  { %v1876_v37 = vrot.slane %v1698_v10, 4  ;;  %v4225_v21 = vmax.f32 %v2096_v38, %v2097_v62  ;;  %v1468_v10 = vrot.slane %v4196_v7, 3 }
 0x251   :  { %v1874_v16 = vsel %vm1826_vm4, %v1872_v26, %v1873_v56  ;;  %v1980_v0 = vadd.f32 %v1873_v56, %v4638_v13  ;;  %v631_v26 = vrot.slane %v4641_v1, 1  ;;  %v2111_v25 = vrot.slane %v2110_v41, 2  ;;  %v4643_v13 = vld [vmem:[#allocation20_spill] sm:$0xff] }
 0x252   :  { %v1977_v57 = vadd.f32 %v1874_v16, %v3872_v6  ;;  %v1877_v59 = vsel %vm1826_vm4, %v1875_v11, %v1876_v37  ;;  %v1981_v36 = vadd.f32 %v1876_v37, %v3888_v34  ;;  %2453 = vrot.lane.b32.xlu1 %v4177_v54, %s2967_s1  ;;  %2455 = vrot.lane.b32.xlu0 %v4184_v50, %s2967_s1  ;;  %v1878_v6 = vrot.slane %v1760_v42, 4 }
 0x253   :  { %2489 = vrot.lane.b32.xlu2 %v4200_v27, %s2966_s0  ;;  %v2115_v9 = vsel %vm1826_vm4, %v1980_v0, -inf  ;;  %v1978_v53 = vadd.f32 %v1877_v59, %v3890_v58  ;;  %v2104_v58 = vmax.f32 %v2102_v14, %v2103_v32  ;;  %v632_v29 = vsel %vm569_vm1, %v630_v48, %v631_v26  ;;  %v4644_v59 = vld [vmem:[#allocation56_spill] sm:$0xff]  ;;  %v4246_v32 = vpop.f32.mrf.mxu3 }
 0x254   :  { %v4218_v23 = vmax.f32 %v1977_v57, %v2115_v9  ;;  %v2123_v34 = vsel %vm1826_vm4, %v1981_v36, -inf  ;;  %v2112_v40 = vmax.f32 %v2110_v41, %v2111_v25  ;;  %v728_v16 = vadd.f32 %v632_v29, %v4642_v55  ;;  %v4645_v9 = vld [vmem:[#allocation54_spill] sm:$0xff] }
 0x255   :  { %v4222_v35 = vmax.f32 %v1978_v53, %v2123_v34  ;;  %v1763_v28 = vpop.f32.mrf.mxu2  ;;  %v2105_v11 = vrot.slane %v2104_v58, 1  ;;  %v731_v0 = vadd.f32 %v631_v26, %v4643_v13  ;;  %v1470_v4 = vsel %vm1407_vm3, %v1468_v10, %v1469_v8 }
 0x256   :  { %v1879_v51 = vrot.slane %v1763_v28, 4  ;;  %v1636_v47 = vpop.f32.mrf.mxu0  ;;  %v4648_v28 = vld [vmem:[#allocation14_spill] sm:$0xff] }
 0x257   :  { %v1701_v45 = vpop.f32.mrf.mxu1  ;;  %v1881_v18 = vrot.slane %v1636_v47, 4  ;;  %v4240_v63 = vmax.f32 %v2104_v58, %v2105_v11 }
 0x258   :  { %v1880_v17 = vsel %vm1826_vm4, %v1878_v6, %v1879_v51  ;;  %v1982_v52 = vadd.f32 %v1879_v51, %v1563_v44  ;;  %v1884_v14 = vrot.slane %v1701_v45, 4  ;;  %v4646_v6 = vld [vmem:[#allocation29_spill] sm:$0xff]  ;;  %v4649_v45 = vld [vmem:[#allocation27_spill] sm:$0xff] }
 0x259   :  { %v1979_v49 = vadd.f32 %v1880_v17, %v1560_v30  ;;  %v4647_v34 = vrot.slane %v4646_v6, 2  ;;  %v2113_v30 = vrot.slane %v2112_v40, 1  ;;  %v1147_v58 = vadd.f32 %v4649_v45, %v728_v16 }
 0x25a   :  { %v2131_v42 = vsel %vm1826_vm4, %v1982_v52, -inf  ;;  %2485 = vrot.lane.b32.xlu1 %v4177_v54, %s2966_s0  ;;  %2233 = vrot.lane.b32.xlu0 %v4155_v61, %s2967_s1 }
 0x25b   :  { %2203 = vrot.lane.b32.xlu2 %v4225_v21, %s2968_s7  ;;  %v4234_v31 = vmax.f32 %v1979_v49, %v2131_v42  ;;  %v1150_v62 = vadd.f32 %v4647_v34, %v731_v0  ;;  %v1566_v48 = vadd.f32 %v1470_v4, %v1147_v58  ;;  %v4265_v11 = vmax.f32 %v2112_v40, %v2113_v30  ;;  %v4652_v4 = vld [vmem:[#allocation22_spill] sm:$0xff]  ;;  %v4655_v30 = vld [vmem:[#allocation64_spill] sm:$0xff] }
 0x25d   :  { %v1766_v22 = vpop.f32.mrf.mxu2  ;;  %v1569_v17 = vadd.f32 %v1469_v8, %v1150_v62 }
 0x25e   :  { %v1639_v56 = vpop.f32.mrf.mxu0 }
 0x25f   :  { %v1882_v12 = vrot.slane %v1639_v56, 4  ;;  %v1704_v37 = vpop.f32.mrf.mxu1 }
 0x260   :  { %v1885_v38 = vrot.slane %v1704_v37, 4  ;;  %v1356_v37 = vpop.f32.mrf.mxu3 }
 0x261   :  { %v1883_v57 = vsel %vm1826_vm4, %v1881_v18, %v1882_v12  ;;  %v1986_v36 = vadd.f32 %v1882_v12, %v4644_v59 }
 0x262   :  { %v1983_v46 = vadd.f32 %v1883_v57, %v3919_v33  ;;  %v1886_v7 = vsel %vm1826_vm4, %v1884_v14, %v1885_v38  ;;  %v1987_v53 = vadd.f32 %v1885_v38, %v4645_v9  ;;  %2199 = vrot.lane.b32.xlu1 %v4120_v39, %s2968_s7  ;;  %2313 = vrot.lane.b32.xlu0 %v4179_v20, %s2968_s7  ;;  %v1887_v33 = vrot.slane %v1766_v22, 4  ;;  %v4650_v22 = vld [vmem:[#allocation58_spill] sm:$0xff]  ;;  %v4651_v14 = vld [vmem:[#allocation59_spill] sm:$0xff] }
 0x263   :  { %2315 = vrot.lane.b32.xlu2 %v4240_v63, %s2968_s7  ;;  %v2139_v19 = vsel %vm1826_vm4, %v1986_v36, -inf  ;;  %v1984_v44 = vadd.f32 %v1886_v7, %v4648_v28  ;;  %v639_v29 = vrot.slane %v4650_v22, 1  ;;  %v640_v56 = vrot.slane %v4651_v14, 1  ;;  %v4653_v28 = vld [vmem:[#allocation24_spill] sm:$0xff] }
 0x264   :  { %v2140_v51 = vmax.f32 %v1983_v46, %v2139_v19  ;;  %v2147_v47 = vsel %vm1826_vm4, %v1987_v53, -inf  ;;  %v1477_v46 = vrot.slane %v4246_v32, 3  ;;  %v1478_v7 = vrot.slane %v1356_v37, 3  ;;  %v4656_v32 = vld [vmem:[#allocation18_spill] sm:$0xff] }
 0x265   :  { %v2148_v2 = vmax.f32 %v1984_v44, %v2147_v47  ;;  %v1769_v41 = vpop.f32.mrf.mxu2  ;;  %v641_v0 = vsel %vm569_vm1, %v639_v29, %v640_v56  ;;  %v737_v44 = vadd.f32 %v640_v56, %v4653_v28  ;;  %v4660_v29 = vld [vmem:[#allocation62_spill] sm:$0xff]  ;;  %v2117_v28 = vrot.slane %v4218_v23, 4 }
 0x266   :  { %v2141_v52 = vrot.slane %v2140_v51, 4  ;;  %v1888_v49 = vrot.slane %v1769_v41, 4  ;;  %v1642_v5 = vpop.f32.mrf.mxu0  ;;  %v734_v19 = vadd.f32 %v641_v0, %v4652_v4 }
 0x267   :  { %v1707_v1 = vpop.f32.mrf.mxu1  ;;  %v2149_v38 = vrot.slane %v2148_v2, 4  ;;  %v1890_v16 = vrot.slane %v1642_v5, 4 }
 0x268   :  { %v2142_v26 = vmax.f32 %v2140_v51, %v2141_v52  ;;  %v1889_v42 = vsel %vm1826_vm4, %v1887_v33, %v1888_v49  ;;  %v1988_v25 = vadd.f32 %v1888_v49, %v1569_v17  ;;  %v1893_v57 = vrot.slane %v1707_v1, 4  ;;  %v4654_v51 = vld [vmem:[#allocation63_spill] sm:$0xff] }
 0x269   :  { %v1985_v18 = vadd.f32 %v1889_v42, %v1566_v48  ;;  %v2150_v6 = vmax.f32 %v2148_v2, %v2149_v38  ;;  %v4657_v2 = vld [vmem:[#allocation31_spill] sm:$0xff]  ;;  %v1479_v49 = vsel %vm1407_vm3, %v1477_v46, %v1478_v7  ;;  %v4659_v48 = vld [vmem:[#allocation16_spill] sm:$0xff]  ;;  %v1153_v14 = vadd.f32 %v4660_v29, %v734_v19 }
 0x26a   :  { %v2143_v10 = vrot.slane %v2142_v26, 2  ;;  %v2155_v12 = vsel %vm1826_vm4, %v1988_v25, -inf  ;;  %2263 = vrot.lane.b32.xlu1 %v4120_v39, %s2966_s0  ;;  %2345 = vrot.lane.b32.xlu0 %v4179_v20, %s2967_s1  ;;  %v4658_v17 = vrot.slane %v4657_v2, 2 }
 0x26b   :  { %2427 = vrot.lane.b32.xlu2 %v4265_v11, %s2968_s7  ;;  %v2156_v8 = vmax.f32 %v1985_v18, %v2155_v12  ;;  %v1572_v38 = vadd.f32 %v1479_v49, %v1153_v14 }
 0x26c   :  { %v2144_v55 = vmax.f32 %v2142_v26, %v2143_v10  ;;  %v1156_v52 = vadd.f32 %v4658_v17, %v737_v44  ;;  %v2151_v26 = vrot.slane %v2150_v6, 2 }
 0x26d   :  { %v4276_v40 = vpop.permute.xlu2 %2227  ;;  %v1772_v13 = vpop.f32.mrf.mxu2 }
 0x26e   :  { %v1645_v59 = vpop.f32.mrf.mxu0  ;;  %v2145_v36 = vrot.slane %v2144_v55, 1  ;;  %v1896_v42 = vrot.slane %v1772_v13, 4  ;;  %v1575_v12 = vadd.f32 %v1478_v7, %v1156_v52  ;;  %v2152_v0 = vmax.f32 %v2150_v6, %v2151_v26 }
 0x26f   :  { %v1891_v9 = vrot.slane %v1645_v59, 4  ;;  %v1710_v53 = vpop.f32.mrf.mxu1 }
 0x270   :  { %v1894_v34 = vrot.slane %v1710_v53, 4  ;;  %v4280_v62 = vmax.f32 %v2144_v55, %v2145_v36  ;;  %v2157_v36 = vrot.slane %v2156_v8, 4  ;;  %v2153_v7 = vrot.slane %v2152_v0, 1 }
 0x271   :  { %v1892_v33 = vsel %vm1826_vm4, %v1890_v16, %v1891_v9  ;;  %v1992_v47 = vadd.f32 %v1891_v9, %v4654_v51 }
 0x272   :  { %v1989_v45 = vadd.f32 %v1892_v33, %v4655_v30  ;;  %v1895_v58 = vsel %vm1826_vm4, %v1893_v57, %v1894_v34  ;;  %v1993_v41 = vadd.f32 %v1894_v34, %v4656_v32  ;;  %2375 = vrot.lane.b32.xlu1 %v4139_v60, %s2966_s0  ;;  %2425 = vrot.lane.b32.xlu0 %v4200_v27, %s2968_s7  ;;  %v4661_v33 = vld [vmem:[#allocation33_spill] sm:$0xff] }
 0x273   :  { %2207 = vrot.lane.b32.xlu2 %v4280_v62, %s2968_s7  ;;  %v2163_v5 = vsel %vm1826_vm4, %v1992_v47, -inf  ;;  %v1990_v1 = vadd.f32 %v1895_v58, %v4659_v48  ;;  %v2158_v9 = vmax.f32 %v2156_v8, %v2157_v36  ;;  %v4314_v53 = vmax.f32 %v2152_v0, %v2153_v7 }
 0x274   :  { %v2164_v25 = vmax.f32 %v1989_v45, %v2163_v5  ;;  %v2171_v18 = vsel %vm1826_vm4, %v1993_v41, -inf  ;;  %v2118_v45 = vmax.f32 %v4218_v23, %v2117_v28 }
 0x275   :  { %v2308_v22 = vpop.permute.xlu2 %2307  ;;  %v4302_v56 = vmax.f32 %v1990_v1, %v2171_v18  ;;  %v1775_v10 = vpop.f32.mrf.mxu2  ;;  %v2159_v6 = vrot.slane %v2158_v9, 2 }
 0x276   :  { %v1897_v37 = vrot.slane %v1775_v10, 4  ;;  %v2165_v34 = vrot.slane %v2164_v25, 4 }
 0x277   :  { %v2160_v30 = vmax.f32 %v2158_v9, %v2159_v6 }
 0x278   :  { %v1898_v55 = vsel %vm1826_vm4, %v1896_v42, %v1897_v37  ;;  %v1994_v16 = vadd.f32 %v1897_v37, %v1575_v12  ;;  %v2166_v51 = vmax.f32 %v2164_v25, %v2165_v34  ;;  %v2125_v42 = vrot.slane %v4222_v35, 4 }
 0x279   :  { %v1991_v57 = vadd.f32 %v1898_v55, %v1572_v38  ;;  %v2161_v52 = vrot.slane %v2160_v30, 1 }
 0x27a   :  { %v2179_v59 = vsel %vm1826_vm4, %v1994_v16, -inf  ;;  %2487 = vrot.lane.b32.xlu1 %v4184_v50, %s2966_s0  ;;  %2457 = vrot.lane.b32.xlu0 %v4200_v27, %s2967_s1  ;;  %v2167_v32 = vrot.slane %v2166_v51, 2  ;;  %v2126_v38 = vmax.f32 %v4222_v35, %v2125_v42  ;;  %v2133_v35 = vrot.slane %v4234_v31, 4 }
 0x27b   :  { %2271 = vrot.lane.b32.xlu2 %v4280_v62, %s2966_s0  ;;  %v4310_v13 = vmax.f32 %v1991_v57, %v2179_v59  ;;  %v4333_v48 = vmax.f32 %v2160_v30, %v2161_v52 }
 0x27c   :  { %v2168_v5 = vmax.f32 %v2166_v51, %v2167_v32  ;;  %v2134_v9 = vmax.f32 %v4234_v31, %v2133_v35 }
 0x27d   :  { %v2340_v46 = vpop.permute.xlu2 %2339  ;;  %v2181_v28 = vrot.slane %v4310_v13, 4 }
 0x27e   :  { %v2169_v29 = vrot.slane %v2168_v5, 1 }
 0x27f   :  { %v2182_v30 = vmax.f32 %v4310_v13, %v2181_v28 }
 0x280   :  { %v4351_v0 = vmax.f32 %v2168_v5, %v2169_v29 }
 0x282   :  { %2201 = vrot.lane.b32.xlu1 %v4155_v61, %s2968_s7  ;;  %2235 = vrot.lane.b32.xlu0 %v4225_v21, %s2967_s1 }
 0x283   :  { %2319 = vrot.lane.b32.xlu2 %v4314_v53, %s2968_s7 }
 0x284   :  { %v2260_v4 = vpop.permute.xlu1 %2259 }
 0x285   :  { %v2420_v19 = vpop.permute.xlu2 %2419  ;;  %v2196_v44 = vpop.permute.xlu0 %2195 }
 0x286   :  { %v2219_v8 = vmax.f32 %v4661_v33, %v2196_v44 }
 0x288   :  { %v2251_v47 = vmax.f32 %v2219_v8, %v4276_v40  ;;  %v2119_v40 = vrot.slane %v2118_v45, 2 }
 0x28a   :  { %v2283_v58 = vmax.f32 %v2251_v47, %v2260_v4  ;;  %2267 = vrot.lane.b32.xlu1 %v4225_v21, %s2966_s0  ;;  %2347 = vrot.lane.b32.xlu0 %v4240_v63, %s2967_s1  ;;  %v2120_v1 = vmax.f32 %v2118_v45, %v2119_v40 }
 0x28b   :  { %2383 = vrot.lane.b32.xlu2 %v4314_v53, %s2966_s0 }
 0x28c   :  { %v2372_v41 = vpop.permute.xlu1 %2371  ;;  %v2291_v2 = vmax.f32 %v2283_v58, %v4039_v24  ;;  %v2173_v24 = vrot.slane %v4302_v56, 4  ;;  %v2121_v10 = vrot.slane %v2120_v1, 1 }
 0x28d   :  { %v2452_v17 = vpop.permute.xlu2 %2451 }
 0x28e   :  { %v2331_v49 = vmax.f32 %v2291_v2, %v2308_v22  ;;  %v2174_v55 = vmax.f32 %v4302_v56, %v2173_v24  ;;  %v4353_v59 = vmax.f32 %v2120_v1, %v2121_v10  ;;  %v2538_v24 = vld [vmem:[%s4505_s3 + $0x18] sm:$0xff] }
 0x28f   :  { %2587 = vmatpush.msra.mxu3 %v2538_v24 }
 0x290   :  { %v2363_v23 = vmax.f32 %v2331_v49, %v2340_v46  ;;  %v2175_v56 = vrot.slane %v2174_v55, 2 }
 0x292   :  { %v2395_v26 = vmax.f32 %v2363_v23, %v2372_v41  ;;  %2379 = vrot.lane.b32.xlu1 %v4240_v63, %s2966_s0  ;;  %2459 = vrot.lane.b32.xlu0 %v4265_v11, %s2967_s1  ;;  %v2176_v6 = vmax.f32 %v2174_v55, %v2175_v56 }
 0x293   :  { %2431 = vrot.lane.b32.xlu2 %v4333_v48, %s2968_s7 }
 0x294   :  { %v2403_v25 = vmax.f32 %v2395_v26, %v4064_v15  ;;  %v4344_v18 = vpop.permute.xlu1 %2483  ;;  %v2198_v14 = vpop.permute.xlu0 %2197  ;;  %v2177_v8 = vrot.slane %v2176_v6, 1 }
 0x295   :  { %v2230_v22 = vpop.permute.xlu2 %2229  ;;  %v2220_v37 = vmax.f32 %v4066_v3, %v2198_v14  ;;  %v2127_v3 = vrot.slane %v2126_v38, 2 }
 0x296   :  { %v2443_v12 = vmax.f32 %v2403_v25, %v2420_v19  ;;  %v2135_v19 = vrot.slane %v2134_v9, 2  ;;  %v4382_v58 = vmax.f32 %v2176_v6, %v2177_v8 }
 0x297   :  { %v2252_v57 = vmax.f32 %v2220_v37, %v2230_v22  ;;  %v2128_v34 = vmax.f32 %v2126_v38, %v2127_v3 }
 0x298   :  { %v4349_v16 = vmax.f32 %v2443_v12, %v2452_v17  ;;  %v2136_v32 = vmax.f32 %v2134_v9, %v2135_v19 }
 0x299   :  { %v2129_v31 = vrot.slane %v2128_v34, 1 }
 0x29a   :  { %v2507_v15 = vmax.f32 %v4349_v16, %v4344_v18  ;;  %2491 = vrot.lane.b32.xlu1 %v4265_v11, %s2966_s0  ;;  %2237 = vrot.lane.b32.xlu0 %v4353_v59, %s2967_s1  ;;  %v2137_v17 = vrot.slane %v2136_v32, 1 }
 0x29b   :  { %2209 = vrot.lane.b32.xlu2 %v4351_v0, %s2968_s7  ;;  %v4380_v45 = vmax.f32 %v2128_v34, %v2129_v31 }
 0x29c   :  { %v2262_v36 = vpop.permute.xlu1 %2261  ;;  %v4392_v49 = vmax.f32 %v2136_v32, %v2137_v17 }
 0x29d   :  { %v4364_v46 = vpop.permute.xlu2 %2265  ;;  %v2284_v7 = vmax.f32 %v2252_v57, %v2262_v36 }
 0x29f   :  { %v2292_v4 = vmax.f32 %v2284_v7, %v4118_v43  ;;  %v2183_v43 = vrot.slane %v2182_v30, 2  ;;  %v2225_v7 = vmax.f32 %v4280_v62, %v4314_v53 }
 0x2a1   :  { %v2184_v40 = vmax.f32 %v2182_v30, %v2183_v43  ;;  %v2257_v34 = vmax.f32 %v2225_v7, %v4333_v48 }
 0x2a2   :  { %2205 = vrot.lane.b32.xlu1 %v4353_v59, %s2968_s7  ;;  %2269 = vrot.lane.b32.xlu0 %v4353_v59, %s2966_s0 }
 0x2a3   :  { %2241 = vrot.lane.b32.xlu2 %v4351_v0, %s2967_s1  ;;  %v2185_v1 = vrot.slane %v2184_v40, 1 }
 0x2a4   :  { %v2310_v44 = vpop.permute.xlu1 %2309  ;;  %v4377_v47 = vpop.permute.xlu0 %2231 }
 0x2a5   :  { %v4375_v33 = vpop.permute.xlu2 %2377  ;;  %v2332_v51 = vmax.f32 %v2292_v4, %v2310_v44  ;;  %v4405_v25 = vmax.f32 %v2184_v40, %v2185_v1 }
 0x2aa   :  { %2317 = vrot.lane.b32.xlu1 %v4380_v45, %s2968_s7  ;;  %2349 = vrot.lane.b32.xlu0 %v4380_v45, %s2967_s1 }
 0x2ab   :  { %2321 = vrot.lane.b32.xlu2 %v4382_v58, %s2968_s7 }
 0x2ac   :  { %v2342_v41 = vpop.permute.xlu1 %2341  ;;  %v2312_v52 = vpop.permute.xlu0 %2311 }
 0x2ad   :  { %v4390_v2 = vpop.permute.xlu2 %2489  ;;  %v2364_v13 = vmax.f32 %v2332_v51, %v2342_v41 }
 0x2b2   :  { %2429 = vrot.lane.b32.xlu1 %v4392_v49, %s2968_s7  ;;  %2381 = vrot.lane.b32.xlu0 %v4380_v45, %s2966_s0 }
 0x2b3   :  { %2353 = vrot.lane.b32.xlu2 %v4382_v58, %s2967_s1 }
 0x2b4   :  { %v2374_v5 = vpop.permute.xlu1 %2373  ;;  %v2344_v42 = vpop.permute.xlu0 %2343 }
 0x2b5   :  { %v4400_v23 = vpop.permute.xlu2 %2203  ;;  %v2396_v26 = vmax.f32 %v2364_v13, %v2374_v5  ;;  %v2537_v5 = vld [vmem:[%s4505_s3 + $0x10] sm:$0xff] }
 0x2b6   :  { %2588 = vmatpush.msra.mxu3 %v2537_v5 }
 0x2b7   :  { %v2404_v22 = vmax.f32 %v2396_v26, %v4177_v54  ;;  %v4431_v54 = vld [vmem:[%s4504_s2] ss:$0 sm:$0xff] }
 0x2b8   :  { %v2519_v9 = vadd.f32 %v4431_v54, %v2507_v15 }
 0x2ba   :  { %2273 = vrot.lane.b32.xlu1 %v4351_v0, %s2966_s0  ;;  %2461 = vrot.lane.b32.xlu0 %v4392_v49, %s2967_s1  ;;  %v2527_v19 = vmax.f32 %v2519_v9, 0.0 }
 0x2bb   :  { %2433 = vrot.lane.b32.xlu2 %v4405_v25, %s2968_s7 }
 0x2bc   :  { %v2422_v29 = vpop.permute.xlu1 %2421  ;;  %v2424_v12 = vpop.permute.xlu0 %2423 }
 0x2bd   :  { %v4414_v14 = vpop.permute.xlu2 %2315  ;;  %v2444_v10 = vmax.f32 %v2404_v22, %v2422_v29 }
 0x2c2   :  { %2385 = vrot.lane.b32.xlu1 %v4382_v58, %s2966_s0  ;;  %2239 = vrot.lane.b32.xlu0 %v4280_v62, %s2967_s1 }
 0x2c3   :  { %2465 = vrot.lane.b32.xlu2 %v4405_v25, %s2967_s1 }
 0x2c4   :  { %v2454_v37 = vpop.permute.xlu1 %2453  ;;  %v2456_v57 = vpop.permute.xlu0 %2455 }
 0x2c5   :  { %v4422_v38 = vpop.permute.xlu2 %2427  ;;  %v2476_v55 = vmax.f32 %v2444_v10, %v2454_v37 }
 0x2ca   :  { %2495 = vrot.lane.b32.xlu1 %v4333_v48, %s2966_s0  ;;  %2351 = vrot.lane.b32.xlu0 %v4314_v53, %s2967_s1 }
 0x2cb   :  { %2497 = vrot.lane.b32.xlu2 %v4405_v25, %s2966_s0 }
 0x2cc   :  { %v2486_v3 = vpop.permute.xlu1 %2485  ;;  %v2234_v36 = vpop.permute.xlu0 %2233 }
 0x2cd   :  { %v2208_v35 = vpop.permute.xlu2 %2207  ;;  %v2508_v56 = vmax.f32 %v2476_v55, %v2486_v3 }
 0x2ce   :  { %v2289_v44 = vmax.f32 %v2257_v34, %v2208_v35  ;;  %v2536_v35 = vld [vmem:[%s4505_s3 + $0x8] sm:$0xff] }
 0x2cf   :  { %v2520_v6 = vadd.f32 %v4431_v54, %v2508_v56  ;;  %2589 = vmatpush.msra.mxu3 %v2536_v35 }
 0x2d1   :  { %v2528_v4 = vmax.f32 %v2520_v6, 0.0 }
 0x2d2   :  { %2463 = vrot.lane.b32.xlu0 %v4333_v48, %s2967_s1 }
 0x2d3   :  { %v2551_v28 = vrot.slane %v2528_v4, 7 }
 0x2d4   :  { %v2200_v31 = vpop.permute.xlu1 %2199  ;;  %v2314_v18 = vpop.permute.xlu0 %2313 }
 0x2d5   :  { %v2272_v8 = vpop.permute.xlu2 %2271  ;;  %v2553_v62 = vsel %vm2552_vm5, %v2551_v28, %v2527_v19  ;;  %v2221_v53 = vmax.f32 %v4120_v39, %v2200_v31 }
 0x2d6   :  { %v4446_v16 = vmax.f32 %v2289_v44, %v2272_v8 }
 0x2d7   :  { %v2253_v15 = vmax.f32 %v2221_v53, %v4377_v47 }
 0x2da   :  { %2493 = vrot.lane.b32.xlu0 %v4392_v49, %s2966_s0 }
 0x2dc   :  { %v2264_v51 = vpop.permute.xlu1 %2263  ;;  %v2346_v32 = vpop.permute.xlu0 %2345 }
 0x2dd   :  { %v2285_v30 = vmax.f32 %v2253_v15, %v2264_v51  ;;  %v4456_v29 = vpop.permute.xlu2 %2319 }
 0x2df   :  { %v2293_v43 = vmax.f32 %v2285_v30, %v4139_v60 }
 0x2e1   :  { %v2333_v41 = vmax.f32 %v2293_v43, %v2312_v52 }
 0x2e3   :  { %v2365_v48 = vmax.f32 %v2333_v41, %v2344_v42 }
 0x2e4   :  { %v2376_v17 = vpop.permute.xlu1 %2375  ;;  %v2426_v40 = vpop.permute.xlu0 %2425 }
 0x2e5   :  { %v2397_v13 = vmax.f32 %v2365_v48, %v2376_v17  ;;  %v4465_v56 = vpop.permute.xlu2 %2383 }
 0x2e7   :  { %v2405_v39 = vmax.f32 %v2397_v13, %v4184_v50  ;;  %v2223_v50 = vmax.f32 %v4225_v21, %v4400_v23 }
 0x2e9   :  { %v2445_v47 = vmax.f32 %v2405_v39, %v2424_v12 }
 0x2eb   :  { %v2477_v1 = vmax.f32 %v2445_v47, %v2456_v57 }
 0x2ec   :  { %v2488_v26 = vpop.permute.xlu1 %2487  ;;  %v2458_v22 = vpop.permute.xlu0 %2457 }
 0x2ed   :  { %v2509_v24 = vmax.f32 %v2477_v1, %v2488_v26  ;;  %v2432_v28 = vpop.permute.xlu2 %2431  ;;  %v2535_v26 = vld [vmem:[%s4505_s3] sm:$0xff] }
 0x2ee   :  { %2590 = vmatpush.msra.mxu3 %v2535_v26 }
 0x2ef   :  { %v2521_v60 = vadd.f32 %v4431_v54, %v2509_v24 }
 0x2f1   :  { %v2529_v52 = vmax.f32 %v2521_v60, 0.0 }
 0x2f3   :  { %v2554_v42 = vrot.slane %v2529_v52, 6 }
 0x2f4   :  { %v2202_v10 = vpop.permute.xlu1 %2201  ;;  %v2236_v3 = vpop.permute.xlu0 %2235 }
 0x2f5   :  { %v2556_v37 = vsel %vm2555_vm6, %v2554_v42, %v2553_v62  ;;  %v2222_v55 = vmax.f32 %v4155_v61, %v2202_v10  ;;  %v2255_v12 = vmax.f32 %v2223_v50, %v2236_v3 }
 0x2f7   :  { %v2254_v57 = vmax.f32 %v2222_v55, %v2234_v36 }
 0x2f9   :  { %v2286_v7 = vmax.f32 %v2254_v57, %v4364_v46 }
 0x2fb   :  { %v2294_v9 = vmax.f32 %v2286_v7, %v4179_v20 }
 0x2fc   :  { %v2268_v6 = vpop.permute.xlu1 %2267  ;;  %v2348_v34 = vpop.permute.xlu0 %2347 }
 0x2fd   :  { %v2334_v21 = vmax.f32 %v2294_v9, %v2314_v18  ;;  %v2287_v23 = vmax.f32 %v2255_v12, %v2268_v6 }
 0x2ff   :  { %v2366_v4 = vmax.f32 %v2334_v21, %v2346_v32  ;;  %v2295_v61 = vmax.f32 %v2287_v23, %v4240_v63 }
 0x301   :  { %v2398_v36 = vmax.f32 %v2366_v4, %v4375_v33  ;;  %v2335_v19 = vmax.f32 %v2295_v61, %v4414_v14  ;;  %v2210_v14 = vpop.permute.xlu2 %2209 }
 0x302   :  { %v2226_v60 = vmax.f32 %v4351_v0, %v2210_v14  ;;  %v2337_v0 = vmax.f32 %v4446_v16, %v4456_v29 }
 0x303   :  { %v2406_v44 = vmax.f32 %v2398_v36, %v4200_v27  ;;  %v2367_v31 = vmax.f32 %v2335_v19, %v2348_v34 }
 0x304   :  { %v2380_v8 = vpop.permute.xlu1 %2379  ;;  %v2460_v53 = vpop.permute.xlu0 %2459 }
 0x305   :  { %v2446_v62 = vmax.f32 %v2406_v44, %v2426_v40  ;;  %v2399_v46 = vmax.f32 %v2367_v31, %v2380_v8 }
 0x307   :  { %v2478_v20 = vmax.f32 %v2446_v62, %v2458_v22  ;;  %v2407_v18 = vmax.f32 %v2399_v46, %v4265_v11 }
 0x309   :  { %v2447_v15 = vmax.f32 %v2407_v18, %v4422_v38  ;;  %v2510_v51 = vmax.f32 %v2478_v20, %v4390_v2  ;;  %v2242_v39 = vpop.permute.xlu2 %2241 }
 0x30a   :  { %v2258_v52 = vmax.f32 %v2226_v60, %v2242_v39 }
 0x30b   :  { %v2479_v63 = vmax.f32 %v2447_v15, %v2460_v53  ;;  %v2522_v33 = vadd.f32 %v4431_v54, %v2510_v51 }
 0x30c   :  { %v2492_v30 = vpop.permute.xlu1 %2491  ;;  %v2238_v27 = vpop.permute.xlu0 %2237 }
 0x30d   :  { %v2530_v32 = vmax.f32 %v2522_v33, 0.0  ;;  %v2511_v43 = vmax.f32 %v2479_v63, %v2492_v30 }
 0x30f   :  { %v2557_v41 = vrot.slane %v2530_v32, 5  ;;  %v2523_v48 = vadd.f32 %v4431_v54, %v2511_v43 }
 0x311   :  { %v2559_v17 = vsel %vm2558_vm7, %v2557_v41, %v2556_v37  ;;  %v2531_v13 = vmax.f32 %v2523_v48, 0.0  ;;  %v2322_v1 = vpop.permute.xlu2 %2321 }
 0x313   :  { %v2560_v11 = vrot.slane %v2531_v13, 4 }
 0x314   :  { %v2206_v40 = vpop.permute.xlu1 %2205  ;;  %v2270_v2 = vpop.permute.xlu0 %2269 }
 0x315   :  { %v4478_v38 = vsel %vm2561_vm8, %v2560_v11, %v2559_v17  ;;  %v2224_v50 = vmax.f32 %v4353_v59, %v2206_v40  ;;  %v2369_v59 = vmax.f32 %v2337_v0, %v4465_v56  ;;  %v2873_v40 = vld [vmem:[%s4506_s4] ss:$0 sm:$0xff] }
 0x317   :  { %v2256_v12 = vmax.f32 %v2224_v50, %v2238_v27 }
 0x319   :  { %v2354_v42 = vpop.permute.xlu2 %2353  ;;  %v2288_v35 = vmax.f32 %v2256_v12, %v2270_v2 }
 0x31b   :  { %v2296_v23 = vmax.f32 %v2288_v35, %v4380_v45 }
 0x31c   :  { %v2318_v5 = vpop.permute.xlu1 %2317  ;;  %v2350_v47 = vpop.permute.xlu0 %2349 }
 0x31d   :  { %v2336_v4 = vmax.f32 %v2296_v23, %v2318_v5 }
 0x31f   :  { %v2368_v44 = vmax.f32 %v2336_v4, %v2350_v47 }
 0x321   :  { %v2434_v7 = vpop.permute.xlu2 %2433 }
 0x324   :  { %v2430_v24 = vpop.permute.xlu1 %2429  ;;  %v2382_v22 = vpop.permute.xlu0 %2381 }
 0x325   :  { %v2400_v8 = vmax.f32 %v2368_v44, %v2382_v22 }
 0x327   :  { %v2408_v45 = vmax.f32 %v2400_v8, %v4392_v49 }
 0x329   :  { %v2466_v19 = vpop.permute.xlu2 %2465  ;;  %v2448_v51 = vmax.f32 %v2408_v45, %v2430_v24 }
 0x32c   :  { %v2274_v10 = vpop.permute.xlu1 %2273  ;;  %v2462_v37 = vpop.permute.xlu0 %2461 }
 0x32d   :  { %v2290_v55 = vmax.f32 %v2258_v52, %v2274_v10  ;;  %v2480_v63 = vmax.f32 %v2448_v51, %v2462_v37 }
 0x32f   :  { %v2298_v3 = vmax.f32 %v2290_v55, %v4382_v58  ;;  %v2401_v58 = vmax.f32 %v2369_v59, %v2432_v28 }
 0x331   :  { %v2338_v57 = vmax.f32 %v2298_v3, %v2322_v1  ;;  %v2498_v16 = vpop.permute.xlu2 %2497 }
 0x333   :  { %v2370_v6 = vmax.f32 %v2338_v57, %v2354_v42 }
 0x334   :  { %v2240_v9 = vpop.permute.xlu0 %2239  ;;  %v2386_v21 = vpop.permute.xlu1 %2385 }
 0x335   :  { %v2402_v34 = vmax.f32 %v2370_v6, %v2386_v21  ;;  %v2409_v31 = vmax.f32 %v2401_v58, %v2240_v9 }
 0x337   :  { %v2410_v36 = vmax.f32 %v2402_v34, %v4405_v25 }
 0x339   :  { %v2450_v62 = vmax.f32 %v2410_v36, %v2434_v7 }
 0x33b   :  { %v2482_v20 = vmax.f32 %v2450_v62, %v2466_v19 }
 0x33c   :  { %v2352_v61 = vpop.permute.xlu0 %2351  ;;  %v2496_v18 = vpop.permute.xlu1 %2495 }
 0x33d   :  { %v2449_v46 = vmax.f32 %v2409_v31, %v2352_v61  ;;  %v2514_v56 = vmax.f32 %v2482_v20, %v2498_v16 }
 0x33f   :  { %v2481_v15 = vmax.f32 %v2449_v46, %v2496_v18  ;;  %v2526_v33 = vadd.f32 %v4431_v54, %v2514_v56 }
 0x341   :  { %v2534_v43 = vmax.f32 %v2526_v33, 0.0 }
 0x343   :  { %v2569_v48 = vrot.slane %v2534_v43, 1 }
 0x344   :  { %v2464_v53 = vpop.permute.xlu0 %2463 }
 0x345   :  { %v2513_v29 = vmax.f32 %v2481_v15, %v2464_v53 }
 0x347   :  { %v2525_v25 = vadd.f32 %v4431_v54, %v2513_v29 }
 0x349   :  { %v2533_v32 = vmax.f32 %v2525_v25, 0.0 }
 0x34b   :  { %v2566_v41 = vrot.slane %v2533_v32, 2 }
 0x34c   :  { %v2494_v28 = vpop.permute.xlu0 %2493 }
 0x34d   :  { %v2512_v30 = vmax.f32 %v2480_v63, %v2494_v28 }
 0x34f   :  { %v2524_v14 = vadd.f32 %v4431_v54, %v2512_v30 }
 0x351   :  { %v2532_v27 = vmax.f32 %v2524_v14, 0.0 }
 0x353   :  { %v2563_v49 = vrot.slane %v2532_v27, 3 }
 0x355   :  { %v2565_v17 = vsel %vm2564_vm9, %v2563_v49, %v4478_v38 }
 0x356   :  { %v2568_v13 = vsel %vm2567_vm10, %v2566_v41, %v2565_v17 }
 0x357   :  { %v2571_v11 = vsel %vm2570_vm11, %v2569_v48, %v2568_v13 }
 0x358   :  { %2855 = vmatmul.msk.f32.vlgmr.msra.gmra.mxu3 %vm2572_vm12, %v2571_v11 }
 0x3db   :  { %v2592_v54 = vpop.f32.mrf.mxu3 }
 0x3dc   :  { %v2593_v2 = vadd.f32 %v2873_v40, %v2592_v54 }
 0x3de   :  { %2596 = vst.msk [vmem:[#allocation7] sm:$0xff] %vm2595_vm13, %v2593_v2 }
 0x3df   :  { %2607 = dma.vmem_to_hbm [thread:$0]  %s2603_s19, 128, %s2605_s22, [#allocation4]  }
 0x3e0   :  { %2958 = dma.done.wait [#allocation4], 128  }
 0x3e1   :  { %2959 = vsyncadd [#allocation4], 4294967168 }
 0x3e2   :  { %2612 = vsyncpa [#allocation3], 1 }
 0x3e3   :  { %2613 = vsyncpa [#allocation6], 1 }
 0x3e4   :  { %2614 = vsyncpa [#allocation4], 1 }

</bundles_post_ra>
